<compile_context>
chip_gen: v7x
topology: tpu7x:2x2x1
jax: 0.10.0
libtpu: 0.0.40
codegen_flags: <defaults>
</compile_context>

<pallas_src>
from functools import partial

import jax
import jax.numpy as jnp
from jax.experimental import pallas as pl
from jax.experimental.pallas import tpu as pltpu


def _trajectory_encoder_kernel(x_ref, wih_ref, whh_ref, b_ref,
                               wproj_ref, bproj_ref, out_ref):
    """x_ref: (B_tile*T, D) batch-major-flattened bf16; out_ref: (B_tile, D) f32."""
    BT, D = x_ref.shape
    Bt = out_ref.shape[0]
    T = BT // Bt
    H = whh_ref.shape[0]

    whh = whh_ref[...]                              # (H, 4H) bf16, resident
    bias = b_ref[...]                               # (1, 4H) f32

    # Prologue: every step's input projection in one MXU call (bf16 in, f32 acc);
    # fold the bias here so the per-step body is just xw[:, t] + h @ W_hh.
    xw = (jnp.dot(x_ref[...], wih_ref[...],
                  preferred_element_type=jnp.float32)
          + bias)                                   # (Bt*T, 4H) f32
    xw = xw.reshape(Bt, T, 4 * H)                   # lane dim (4H) untouched

    # Per-lane pre-scale so ONE tanh push activates the whole 4H slab:
    #   sigmoid(x) = 0.5 * tanh(0.5 * x) + 0.5   (i, f, o lanes -> scale 0.5)
    #   tanh(x)                                   (g lanes       -> scale 1.0)
    lane = jax.lax.broadcasted_iota(jnp.int32, (1, 4 * H), 1)
    pre = jnp.where((lane >= 2 * H) & (lane < 3 * H), 1.0, 0.5)   # (1, 4H) f32

    def step(gates, c_prev):
        t = jnp.tanh(gates * pre)                   # single EUP push for the slab
        i_g = 0.5 * t[:, 0 * H:1 * H] + 0.5
        f_g = 0.5 * t[:, 1 * H:2 * H] + 0.5
        g_g = t[:, 2 * H:3 * H]
        o_g = 0.5 * t[:, 3 * H:4 * H] + 0.5
        c = i_g * g_g if c_prev is None else f_g * c_prev + i_g * g_g
        h = o_g * jnp.tanh(c)
        return h, c

    # Peeled first step: h0 = c0 = 0  ->  gates = xw[:, 0] (bias already folded).
    h, c = step(xw[:, 0, :], None)

    # Remaining steps, fully unrolled (T static & small). Serial dependence chain:
    # one small bf16 (Bt, H) @ (H, 4H) MXU pass + one EUP tanh slab + tanh(c).
    for t_step in range(1, T):
        gates = xw[:, t_step, :] + jnp.dot(
            h.astype(jnp.bfloat16), whh, preferred_element_type=jnp.float32)
        h, c = step(gates, c)

    # proj(h_n[-1])
    out_ref[...] = (jnp.dot(h.astype(jnp.bfloat16), wproj_ref[...],
                            preferred_element_type=jnp.float32)
                    + bproj_ref[...])


def _round_up(n, m):
    return ((n + m - 1) // m) * m


def _pick_batch_tile(B, T, D, H):
    """Batch-tile size: multiple of 8 sublanes, sized against this chip's VMEM."""
    try:
        vmem_bytes = pltpu.get_tpu_info().vmem_capacity_bytes
    except Exception:  # pragma: no cover - conservative fallback (v7x has 64 MiB)
        vmem_bytes = 64 << 20
    # Rough per-trajectory VMEM per grid step: double-buffered bf16 x tile,
    # resident f32 xw slab, f32 gate/h/c temporaries; 2x slack on top.
    per_row = 2 * (2 * 2 * T * D + 4 * T * 4 * H + 8 * 4 * H)
    budget = min(vmem_bytes // 4, 32 << 20)   # stay well inside the scoped default
    cap = max(8, min(512, (budget // per_row) // 8 * 8))
    return min(cap, _round_up(B, 8))


@partial(jax.jit, static_argnames=("b_tile",))
def _trajectory_encoder_impl(x, w_ih, w_hh, b_ih, b_hh, w_proj, b_proj, *, b_tile):
    B, T, D = x.shape
    H = w_hh.shape[1]                               # PyTorch w_hh is (4H, H)
    B_pad = _round_up(B, b_tile)

    # Plain-JAX glue: right-multiply parameter layout; bf16 matmul operands
    # (MXU-native on v5e/v6e/v7x), f32 biases.
    wih_t = jnp.transpose(w_ih).astype(jnp.bfloat16)       # (D, 4H)
    whh_t = jnp.transpose(w_hh).astype(jnp.bfloat16)       # (H, 4H)
    bias = (b_ih + b_hh).reshape(1, 4 * H).astype(jnp.float32)
    wproj_t = jnp.transpose(w_proj).astype(jnp.bfloat16)   # (H, D)
    bproj = b_proj.reshape(1, D).astype(jnp.float32)

    # Batch-major flatten: free reshape (NO transpose, no extra HBM round-trip).
    # Row b*T + t is (trajectory b, step t); a batch tile is a contiguous row block.
    x_flat = x.reshape(B * T, D).astype(jnp.bfloat16)
    if B_pad != B:
        x_flat = jnp.pad(x_flat, ((0, (B_pad - B) * T), (0, 0)))

    out = pl.pallas_call(
        _trajectory_encoder_kernel,
        out_shape=jax.ShapeDtypeStruct((B_pad, D), jnp.float32),
        grid=(B_pad // b_tile,),
        in_specs=[
            pl.BlockSpec((b_tile * T, D), lambda i: (i, 0)),   # x batch tile
            pl.BlockSpec((D, 4 * H), lambda i: (0, 0)),        # weights: same block
            pl.BlockSpec((H, 4 * H), lambda i: (0, 0)),        #   every grid step ->
            pl.BlockSpec((1, 4 * H), lambda i: (0, 0)),        #   stay VMEM-resident
            pl.BlockSpec((H, D), lambda i: (0, 0)),
            pl.BlockSpec((1, D), lambda i: (0, 0)),
        ],
        out_specs=pl.BlockSpec((b_tile, D), lambda i: (i, 0)),
        compiler_params=pltpu.CompilerParams(
            dimension_semantics=("parallel",)),
    )(x_flat, wih_t, whh_t, bias, wproj_t, bproj)
    return out[:B]


def trajectory_encoder(x, w_ih, w_hh, b_ih, b_hh, w_proj, b_proj):
    """x: (B, T, D) batch_first, like PyTorch. Returns (B, D)."""
    B, T, D = x.shape
    H = w_hh.shape[1]
    b_tile = _pick_batch_tile(B, T, D, H)
    return _trajectory_encoder_impl(x, w_ih, w_hh, b_ih, b_hh, w_proj, b_proj,
                                    b_tile=b_tile)


def _reference(x, w_ih, w_hh, b_ih, b_hh, w_proj, b_proj):
    """Pure-JAX f32 reference matching torch.nn.LSTM(batch_first=True) + Linear."""
    B, T, D = x.shape
    H = w_hh.shape[1]
    h = jnp.zeros((B, H), jnp.float32)
    c = jnp.zeros((B, H), jnp.float32)
    for t in range(T):
        gates = x[:, t, :] @ w_ih.T + b_ih + h @ w_hh.T + b_hh
        i = jax.nn.sigmoid(gates[:, 0 * H:1 * H])
        f = jax.nn.sigmoid(gates[:, 1 * H:2 * H])
        g = jnp.tanh(gates[:, 2 * H:3 * H])
        o = jax.nn.sigmoid(gates[:, 3 * H:4 * H])
        c = f * c + i * g
        h = o * jnp.tanh(c)
    return h @ w_proj.T + b_proj


if __name__ == "__main__":
    # Small shapes consistent with the module: batch=2, seq=8, repr_dim=32, hidden_dim=32.
    B, T, REPR_DIM, HIDDEN_DIM = 2, 8, 32, 32

    key = jax.random.PRNGKey(0)
    ks = jax.random.split(key, 8)
    bound_lstm = 1.0 / jnp.sqrt(HIDDEN_DIM)
    bound_proj = 1.0 / jnp.sqrt(HIDDEN_DIM)

    # PyTorch parameter shapes: weight_ih_l0 (4H, D), weight_hh_l0 (4H, H),
    # bias_ih_l0 (4H,), bias_hh_l0 (4H,), proj.weight (D, H), proj.bias (D,)
    w_ih = jax.random.uniform(ks[0], (4 * HIDDEN_DIM, REPR_DIM), jnp.float32,
                              -bound_lstm, bound_lstm)
    w_hh = jax.random.uniform(ks[1], (4 * HIDDEN_DIM, HIDDEN_DIM), jnp.float32,
                              -bound_lstm, bound_lstm)
    b_ih = jax.random.uniform(ks[2], (4 * HIDDEN_DIM,), jnp.float32,
                              -bound_lstm, bound_lstm)
    b_hh = jax.random.uniform(ks[3], (4 * HIDDEN_DIM,), jnp.float32,
                              -bound_lstm, bound_lstm)
    w_proj = jax.random.uniform(ks[4], (REPR_DIM, HIDDEN_DIM), jnp.float32,
                                -bound_proj, bound_proj)
    b_proj = jax.random.uniform(ks[5], (REPR_DIM,), jnp.float32,
                                -bound_proj, bound_proj)

    x = jax.random.normal(ks[6], (B, T, REPR_DIM), jnp.float32)

    out = trajectory_encoder(x, w_ih, w_hh, b_ih, b_hh, w_proj, b_proj)
    out = jax.block_until_ready(out)

    ref = _reference(x, w_ih, w_hh, b_ih, b_hh, w_proj, b_proj)
    assert out.shape == (B, REPR_DIM), out.shape
    # bf16 matmul operands inside the kernel -> loosened tolerance vs f32 reference.
    assert jnp.allclose(out, ref, atol=3e-2, rtol=3e-2), \
        f"max err {jnp.max(jnp.abs(out - ref))}"

    print("KERNEL_OK")
</pallas_src>

<mosaic_0001>
module attributes {stable_mosaic.version = 11 : i64} {
  func.func @_trajectory_encoder_kernel(%arg0: i32, %arg1: memref<64x32xbf16, #tpu.memory_space<vmem>>, %arg2: memref<32x128xbf16, #tpu.memory_space<vmem>>, %arg3: memref<32x128xbf16, #tpu.memory_space<vmem>>, %arg4: memref<1x128xf32, #tpu.memory_space<vmem>>, %arg5: memref<32x32xbf16, #tpu.memory_space<vmem>>, %arg6: memref<1x32xf32, #tpu.memory_space<vmem>>, %arg7: memref<8x32xf32, #tpu.memory_space<vmem>>) attributes {dimension_semantics = [#tpu.dimension_semantics<parallel>], iteration_bounds = array<i64: 1>, scalar_prefetch = 0 : i64, scratch_operands = 0 : i64, tpu.core_type = #tpu.core_type<tc>, window_params = [{transform_indices = @transform_0, window_bounds = array<i64: 64, 32>}, {pipeline_mode = #tpu.pipeline_mode<synchronous>, transform_indices = @transform_1, window_bounds = array<i64: 32, 128>}, {pipeline_mode = #tpu.pipeline_mode<synchronous>, transform_indices = @transform_2, window_bounds = array<i64: 32, 128>}, {pipeline_mode = #tpu.pipeline_mode<synchronous>, transform_indices = @transform_3, window_bounds = array<i64: 1, 128>}, {pipeline_mode = #tpu.pipeline_mode<synchronous>, transform_indices = @transform_4, window_bounds = array<i64: 32, 32>}, {pipeline_mode = #tpu.pipeline_mode<synchronous>, transform_indices = @transform_5, window_bounds = array<i64: 1, 32>}, {transform_indices = @transform_6, window_bounds = array<i64: 8, 32>}]} {
    %c0 = arith.constant 0 : index
    %c0_0 = arith.constant 0 : index
    %0 = vector.load %arg3[%c0, %c0_0] : memref<32x128xbf16, #tpu.memory_space<vmem>>, vector<32x128xbf16>
    %c0_1 = arith.constant 0 : index
    %c0_2 = arith.constant 0 : index
    %1 = vector.load %arg4[%c0_1, %c0_2] : memref<1x128xf32, #tpu.memory_space<vmem>>, vector<1x128xf32>
    %c0_3 = arith.constant 0 : index
    %c0_4 = arith.constant 0 : index
    %2 = vector.load %arg1[%c0_3, %c0_4] : memref<64x32xbf16, #tpu.memory_space<vmem>>, vector<64x32xbf16>
    %c0_5 = arith.constant 0 : index
    %c0_6 = arith.constant 0 : index
    %3 = vector.load %arg2[%c0_5, %c0_6] : memref<32x128xbf16, #tpu.memory_space<vmem>>, vector<32x128xbf16>
    %cst = arith.constant dense<0.000000e+00> : vector<64x128xf32>
    %4 = tpu.matmul %2, %3, %cst {dimension_numbers = #tpu.dot_dimension_numbers<[1], [0], [0], [1], [0, 0, 1, 1], [], []>} : vector<64x32xbf16>, vector<32x128xbf16>, vector<64x128xf32> -> vector<64x128xf32>
    %5 = vector.broadcast %1 : vector<1x128xf32> to vector<64x128xf32>
    %6 = arith.addf %4, %5 : vector<64x128xf32>
    %7 = vector.shape_cast %6 : vector<64x128xf32> to vector<8x8x128xf32>
    %8 = tpu.iota {dimensions = array<i32: 1>} : vector<1x128xi32>
    %c64_i32 = arith.constant 64 : i32
    %9 = vector.broadcast %c64_i32 : i32 to vector<1x128xi32>
    %10 = arith.cmpi sge, %8, %9 : vector<1x128xi32>
    %c96_i32 = arith.constant 96 : i32
    %11 = vector.broadcast %c96_i32 : i32 to vector<1x128xi32>
    %12 = arith.cmpi slt, %8, %11 : vector<1x128xi32>
    %13 = arith.andi %10, %12 : vector<1x128xi1>
    %cst_7 = arith.constant 1.000000e+00 : f32
    %cst_8 = arith.constant 5.000000e-01 : f32
    %14 = vector.broadcast %cst_7 : f32 to vector<1x128xf32>
    %15 = vector.broadcast %cst_8 : f32 to vector<1x128xf32>
    %16 = arith.select %13, %14, %15 : vector<1x128xi1>, vector<1x128xf32>
    %17 = vector.extract_strided_slice %7 {offsets = [0, 0, 0], sizes = [8, 1, 128], strides = [1, 1, 1]} : vector<8x8x128xf32> to vector<8x1x128xf32>
    %18 = vector.shape_cast %17 : vector<8x1x128xf32> to vector<8x128xf32>
    %19 = vector.broadcast %16 : vector<1x128xf32> to vector<8x128xf32>
    %20 = arith.mulf %18, %19 : vector<8x128xf32>
    %21 = math.tanh %20 : vector<8x128xf32>
    %22 = vector.extract_strided_slice %21 {offsets = [0, 0], sizes = [8, 32], strides = [1, 1]} : vector<8x128xf32> to vector<8x32xf32>
    %cst_9 = arith.constant 5.000000e-01 : f32
    %23 = vector.broadcast %cst_9 : f32 to vector<8x32xf32>
    %24 = arith.mulf %23, %22 : vector<8x32xf32>
    %cst_10 = arith.constant 5.000000e-01 : f32
    %25 = vector.broadcast %cst_10 : f32 to vector<8x32xf32>
    %26 = arith.addf %24, %25 : vector<8x32xf32>
    %27 = vector.extract_strided_slice %21 {offsets = [0, 64], sizes = [8, 32], strides = [1, 1]} : vector<8x128xf32> to vector<8x32xf32>
    %28 = vector.extract_strided_slice %21 {offsets = [0, 96], sizes = [8, 32], strides = [1, 1]} : vector<8x128xf32> to vector<8x32xf32>
    %cst_11 = arith.constant 5.000000e-01 : f32
    %29 = vector.broadcast %cst_11 : f32 to vector<8x32xf32>
    %30 = arith.mulf %29, %28 : vector<8x32xf32>
    %cst_12 = arith.constant 5.000000e-01 : f32
    %31 = vector.broadcast %cst_12 : f32 to vector<8x32xf32>
    %32 = arith.addf %30, %31 : vector<8x32xf32>
    %33 = arith.mulf %26, %27 : vector<8x32xf32>
    %34 = math.tanh %33 : vector<8x32xf32>
    %35 = arith.mulf %32, %34 : vector<8x32xf32>
    %36 = vector.extract_strided_slice %7 {offsets = [0, 1, 0], sizes = [8, 1, 128], strides = [1, 1, 1]} : vector<8x8x128xf32> to vector<8x1x128xf32>
    %37 = vector.shape_cast %36 : vector<8x1x128xf32> to vector<8x128xf32>
    %38 = arith.truncf %35 : vector<8x32xf32> to vector<8x32xbf16>
    %cst_13 = arith.constant dense<0.000000e+00> : vector<8x128xf32>
    %39 = tpu.matmul %38, %0, %cst_13 {dimension_numbers = #tpu.dot_dimension_numbers<[1], [0], [0], [1], [0, 0, 1, 1], [], []>} : vector<8x32xbf16>, vector<32x128xbf16>, vector<8x128xf32> -> vector<8x128xf32>
    %40 = arith.addf %37, %39 : vector<8x128xf32>
    %41 = vector.broadcast %16 : vector<1x128xf32> to vector<8x128xf32>
    %42 = arith.mulf %40, %41 : vector<8x128xf32>
    %43 = math.tanh %42 : vector<8x128xf32>
    %44 = vector.extract_strided_slice %43 {offsets = [0, 0], sizes = [8, 32], strides = [1, 1]} : vector<8x128xf32> to vector<8x32xf32>
    %cst_14 = arith.constant 5.000000e-01 : f32
    %45 = vector.broadcast %cst_14 : f32 to vector<8x32xf32>
    %46 = arith.mulf %45, %44 : vector<8x32xf32>
    %cst_15 = arith.constant 5.000000e-01 : f32
    %47 = vector.broadcast %cst_15 : f32 to vector<8x32xf32>
    %48 = arith.addf %46, %47 : vector<8x32xf32>
    %49 = vector.extract_strided_slice %43 {offsets = [0, 32], sizes = [8, 32], strides = [1, 1]} : vector<8x128xf32> to vector<8x32xf32>
    %cst_16 = arith.constant 5.000000e-01 : f32
    %50 = vector.broadcast %cst_16 : f32 to vector<8x32xf32>
    %51 = arith.mulf %50, %49 : vector<8x32xf32>
    %cst_17 = arith.constant 5.000000e-01 : f32
    %52 = vector.broadcast %cst_17 : f32 to vector<8x32xf32>
    %53 = arith.addf %51, %52 : vector<8x32xf32>
    %54 = vector.extract_strided_slice %43 {offsets = [0, 64], sizes = [8, 32], strides = [1, 1]} : vector<8x128xf32> to vector<8x32xf32>
    %55 = vector.extract_strided_slice %43 {offsets = [0, 96], sizes = [8, 32], strides = [1, 1]} : vector<8x128xf32> to vector<8x32xf32>
    %cst_18 = arith.constant 5.000000e-01 : f32
    %56 = vector.broadcast %cst_18 : f32 to vector<8x32xf32>
    %57 = arith.mulf %56, %55 : vector<8x32xf32>
    %cst_19 = arith.constant 5.000000e-01 : f32
    %58 = vector.broadcast %cst_19 : f32 to vector<8x32xf32>
    %59 = arith.addf %57, %58 : vector<8x32xf32>
    %60 = arith.mulf %53, %33 : vector<8x32xf32>
    %61 = arith.mulf %48, %54 : vector<8x32xf32>
    %62 = arith.addf %60, %61 : vector<8x32xf32>
    %63 = math.tanh %62 : vector<8x32xf32>
    %64 = arith.mulf %59, %63 : vector<8x32xf32>
    %65 = vector.extract_strided_slice %7 {offsets = [0, 2, 0], sizes = [8, 1, 128], strides = [1, 1, 1]} : vector<8x8x128xf32> to vector<8x1x128xf32>
    %66 = vector.shape_cast %65 : vector<8x1x128xf32> to vector<8x128xf32>
    %67 = arith.truncf %64 : vector<8x32xf32> to vector<8x32xbf16>
    %cst_20 = arith.constant dense<0.000000e+00> : vector<8x128xf32>
    %68 = tpu.matmul %67, %0, %cst_20 {dimension_numbers = #tpu.dot_dimension_numbers<[1], [0], [0], [1], [0, 0, 1, 1], [], []>} : vector<8x32xbf16>, vector<32x128xbf16>, vector<8x128xf32> -> vector<8x128xf32>
    %69 = arith.addf %66, %68 : vector<8x128xf32>
    %70 = vector.broadcast %16 : vector<1x128xf32> to vector<8x128xf32>
    %71 = arith.mulf %69, %70 : vector<8x128xf32>
    %72 = math.tanh %71 : vector<8x128xf32>
    %73 = vector.extract_strided_slice %72 {offsets = [0, 0], sizes = [8, 32], strides = [1, 1]} : vector<8x128xf32> to vector<8x32xf32>
    %cst_21 = arith.constant 5.000000e-01 : f32
    %74 = vector.broadcast %cst_21 : f32 to vector<8x32xf32>
    %75 = arith.mulf %74, %73 : vector<8x32xf32>
    %cst_22 = arith.constant 5.000000e-01 : f32
    %76 = vector.broadcast %cst_22 : f32 to vector<8x32xf32>
    %77 = arith.addf %75, %76 : vector<8x32xf32>
    %78 = vector.extract_strided_slice %72 {offsets = [0, 32], sizes = [8, 32], strides = [1, 1]} : vector<8x128xf32> to vector<8x32xf32>
    %cst_23 = arith.constant 5.000000e-01 : f32
    %79 = vector.broadcast %cst_23 : f32 to vector<8x32xf32>
    %80 = arith.mulf %79, %78 : vector<8x32xf32>
    %cst_24 = arith.constant 5.000000e-01 : f32
    %81 = vector.broadcast %cst_24 : f32 to vector<8x32xf32>
    %82 = arith.addf %80, %81 : vector<8x32xf32>
    %83 = vector.extract_strided_slice %72 {offsets = [0, 64], sizes = [8, 32], strides = [1, 1]} : vector<8x128xf32> to vector<8x32xf32>
    %84 = vector.extract_strided_slice %72 {offsets = [0, 96], sizes = [8, 32], strides = [1, 1]} : vector<8x128xf32> to vector<8x32xf32>
    %cst_25 = arith.constant 5.000000e-01 : f32
    %85 = vector.broadcast %cst_25 : f32 to vector<8x32xf32>
    %86 = arith.mulf %85, %84 : vector<8x32xf32>
    %cst_26 = arith.constant 5.000000e-01 : f32
    %87 = vector.broadcast %cst_26 : f32 to vector<8x32xf32>
    %88 = arith.addf %86, %87 : vector<8x32xf32>
    %89 = arith.mulf %82, %62 : vector<8x32xf32>
    %90 = arith.mulf %77, %83 : vector<8x32xf32>
    %91 = arith.addf %89, %90 : vector<8x32xf32>
    %92 = math.tanh %91 : vector<8x32xf32>
    %93 = arith.mulf %88, %92 : vector<8x32xf32>
    %94 = vector.extract_strided_slice %7 {offsets = [0, 3, 0], sizes = [8, 1, 128], strides = [1, 1, 1]} : vector<8x8x128xf32> to vector<8x1x128xf32>
    %95 = vector.shape_cast %94 : vector<8x1x128xf32> to vector<8x128xf32>
    %96 = arith.truncf %93 : vector<8x32xf32> to vector<8x32xbf16>
    %cst_27 = arith.constant dense<0.000000e+00> : vector<8x128xf32>
    %97 = tpu.matmul %96, %0, %cst_27 {dimension_numbers = #tpu.dot_dimension_numbers<[1], [0], [0], [1], [0, 0, 1, 1], [], []>} : vector<8x32xbf16>, vector<32x128xbf16>, vector<8x128xf32> -> vector<8x128xf32>
    %98 = arith.addf %95, %97 : vector<8x128xf32>
    %99 = vector.broadcast %16 : vector<1x128xf32> to vector<8x128xf32>
    %100 = arith.mulf %98, %99 : vector<8x128xf32>
    %101 = math.tanh %100 : vector<8x128xf32>
    %102 = vector.extract_strided_slice %101 {offsets = [0, 0], sizes = [8, 32], strides = [1, 1]} : vector<8x128xf32> to vector<8x32xf32>
    %cst_28 = arith.constant 5.000000e-01 : f32
    %103 = vector.broadcast %cst_28 : f32 to vector<8x32xf32>
    %104 = arith.mulf %103, %102 : vector<8x32xf32>
    %cst_29 = arith.constant 5.000000e-01 : f32
    %105 = vector.broadcast %cst_29 : f32 to vector<8x32xf32>
    %106 = arith.addf %104, %105 : vector<8x32xf32>
    %107 = vector.extract_strided_slice %101 {offsets = [0, 32], sizes = [8, 32], strides = [1, 1]} : vector<8x128xf32> to vector<8x32xf32>
    %cst_30 = arith.constant 5.000000e-01 : f32
    %108 = vector.broadcast %cst_30 : f32 to vector<8x32xf32>
    %109 = arith.mulf %108, %107 : vector<8x32xf32>
    %cst_31 = arith.constant 5.000000e-01 : f32
    %110 = vector.broadcast %cst_31 : f32 to vector<8x32xf32>
    %111 = arith.addf %109, %110 : vector<8x32xf32>
    %112 = vector.extract_strided_slice %101 {offsets = [0, 64], sizes = [8, 32], strides = [1, 1]} : vector<8x128xf32> to vector<8x32xf32>
    %113 = vector.extract_strided_slice %101 {offsets = [0, 96], sizes = [8, 32], strides = [1, 1]} : vector<8x128xf32> to vector<8x32xf32>
    %cst_32 = arith.constant 5.000000e-01 : f32
    %114 = vector.broadcast %cst_32 : f32 to vector<8x32xf32>
    %115 = arith.mulf %114, %113 : vector<8x32xf32>
    %cst_33 = arith.constant 5.000000e-01 : f32
    %116 = vector.broadcast %cst_33 : f32 to vector<8x32xf32>
    %117 = arith.addf %115, %116 : vector<8x32xf32>
    %118 = arith.mulf %111, %91 : vector<8x32xf32>
    %119 = arith.mulf %106, %112 : vector<8x32xf32>
    %120 = arith.addf %118, %119 : vector<8x32xf32>
    %121 = math.tanh %120 : vector<8x32xf32>
    %122 = arith.mulf %117, %121 : vector<8x32xf32>
    %123 = vector.extract_strided_slice %7 {offsets = [0, 4, 0], sizes = [8, 1, 128], strides = [1, 1, 1]} : vector<8x8x128xf32> to vector<8x1x128xf32>
    %124 = vector.shape_cast %123 : vector<8x1x128xf32> to vector<8x128xf32>
    %125 = arith.truncf %122 : vector<8x32xf32> to vector<8x32xbf16>
    %cst_34 = arith.constant dense<0.000000e+00> : vector<8x128xf32>
    %126 = tpu.matmul %125, %0, %cst_34 {dimension_numbers = #tpu.dot_dimension_numbers<[1], [0], [0], [1], [0, 0, 1, 1], [], []>} : vector<8x32xbf16>, vector<32x128xbf16>, vector<8x128xf32> -> vector<8x128xf32>
    %127 = arith.addf %124, %126 : vector<8x128xf32>
    %128 = vector.broadcast %16 : vector<1x128xf32> to vector<8x128xf32>
    %129 = arith.mulf %127, %128 : vector<8x128xf32>
    %130 = math.tanh %129 : vector<8x128xf32>
    %131 = vector.extract_strided_slice %130 {offsets = [0, 0], sizes = [8, 32], strides = [1, 1]} : vector<8x128xf32> to vector<8x32xf32>
    %cst_35 = arith.constant 5.000000e-01 : f32
    %132 = vector.broadcast %cst_35 : f32 to vector<8x32xf32>
    %133 = arith.mulf %132, %131 : vector<8x32xf32>
    %cst_36 = arith.constant 5.000000e-01 : f32
    %134 = vector.broadcast %cst_36 : f32 to vector<8x32xf32>
    %135 = arith.addf %133, %134 : vector<8x32xf32>
    %136 = vector.extract_strided_slice %130 {offsets = [0, 32], sizes = [8, 32], strides = [1, 1]} : vector<8x128xf32> to vector<8x32xf32>
    %cst_37 = arith.constant 5.000000e-01 : f32
    %137 = vector.broadcast %cst_37 : f32 to vector<8x32xf32>
    %138 = arith.mulf %137, %136 : vector<8x32xf32>
    %cst_38 = arith.constant 5.000000e-01 : f32
    %139 = vector.broadcast %cst_38 : f32 to vector<8x32xf32>
    %140 = arith.addf %138, %139 : vector<8x32xf32>
    %141 = vector.extract_strided_slice %130 {offsets = [0, 64], sizes = [8, 32], strides = [1, 1]} : vector<8x128xf32> to vector<8x32xf32>
    %142 = vector.extract_strided_slice %130 {offsets = [0, 96], sizes = [8, 32], strides = [1, 1]} : vector<8x128xf32> to vector<8x32xf32>
    %cst_39 = arith.constant 5.000000e-01 : f32
    %143 = vector.broadcast %cst_39 : f32 to vector<8x32xf32>
    %144 = arith.mulf %143, %142 : vector<8x32xf32>
    %cst_40 = arith.constant 5.000000e-01 : f32
    %145 = vector.broadcast %cst_40 : f32 to vector<8x32xf32>
    %146 = arith.addf %144, %145 : vector<8x32xf32>
    %147 = arith.mulf %140, %120 : vector<8x32xf32>
    %148 = arith.mulf %135, %141 : vector<8x32xf32>
    %149 = arith.addf %147, %148 : vector<8x32xf32>
    %150 = math.tanh %149 : vector<8x32xf32>
    %151 = arith.mulf %146, %150 : vector<8x32xf32>
    %152 = vector.extract_strided_slice %7 {offsets = [0, 5, 0], sizes = [8, 1, 128], strides = [1, 1, 1]} : vector<8x8x128xf32> to vector<8x1x128xf32>
    %153 = vector.shape_cast %152 : vector<8x1x128xf32> to vector<8x128xf32>
    %154 = arith.truncf %151 : vector<8x32xf32> to vector<8x32xbf16>
    %cst_41 = arith.constant dense<0.000000e+00> : vector<8x128xf32>
    %155 = tpu.matmul %154, %0, %cst_41 {dimension_numbers = #tpu.dot_dimension_numbers<[1], [0], [0], [1], [0, 0, 1, 1], [], []>} : vector<8x32xbf16>, vector<32x128xbf16>, vector<8x128xf32> -> vector<8x128xf32>
    %156 = arith.addf %153, %155 : vector<8x128xf32>
    %157 = vector.broadcast %16 : vector<1x128xf32> to vector<8x128xf32>
    %158 = arith.mulf %156, %157 : vector<8x128xf32>
    %159 = math.tanh %158 : vector<8x128xf32>
    %160 = vector.extract_strided_slice %159 {offsets = [0, 0], sizes = [8, 32], strides = [1, 1]} : vector<8x128xf32> to vector<8x32xf32>
    %cst_42 = arith.constant 5.000000e-01 : f32
    %161 = vector.broadcast %cst_42 : f32 to vector<8x32xf32>
    %162 = arith.mulf %161, %160 : vector<8x32xf32>
    %cst_43 = arith.constant 5.000000e-01 : f32
    %163 = vector.broadcast %cst_43 : f32 to vector<8x32xf32>
    %164 = arith.addf %162, %163 : vector<8x32xf32>
    %165 = vector.extract_strided_slice %159 {offsets = [0, 32], sizes = [8, 32], strides = [1, 1]} : vector<8x128xf32> to vector<8x32xf32>
    %cst_44 = arith.constant 5.000000e-01 : f32
    %166 = vector.broadcast %cst_44 : f32 to vector<8x32xf32>
    %167 = arith.mulf %166, %165 : vector<8x32xf32>
    %cst_45 = arith.constant 5.000000e-01 : f32
    %168 = vector.broadcast %cst_45 : f32 to vector<8x32xf32>
    %169 = arith.addf %167, %168 : vector<8x32xf32>
    %170 = vector.extract_strided_slice %159 {offsets = [0, 64], sizes = [8, 32], strides = [1, 1]} : vector<8x128xf32> to vector<8x32xf32>
    %171 = vector.extract_strided_slice %159 {offsets = [0, 96], sizes = [8, 32], strides = [1, 1]} : vector<8x128xf32> to vector<8x32xf32>
    %cst_46 = arith.constant 5.000000e-01 : f32
    %172 = vector.broadcast %cst_46 : f32 to vector<8x32xf32>
    %173 = arith.mulf %172, %171 : vector<8x32xf32>
    %cst_47 = arith.constant 5.000000e-01 : f32
    %174 = vector.broadcast %cst_47 : f32 to vector<8x32xf32>
    %175 = arith.addf %173, %174 : vector<8x32xf32>
    %176 = arith.mulf %169, %149 : vector<8x32xf32>
    %177 = arith.mulf %164, %170 : vector<8x32xf32>
    %178 = arith.addf %176, %177 : vector<8x32xf32>
    %179 = math.tanh %178 : vector<8x32xf32>
    %180 = arith.mulf %175, %179 : vector<8x32xf32>
    %181 = vector.extract_strided_slice %7 {offsets = [0, 6, 0], sizes = [8, 1, 128], strides = [1, 1, 1]} : vector<8x8x128xf32> to vector<8x1x128xf32>
    %182 = vector.shape_cast %181 : vector<8x1x128xf32> to vector<8x128xf32>
    %183 = arith.truncf %180 : vector<8x32xf32> to vector<8x32xbf16>
    %cst_48 = arith.constant dense<0.000000e+00> : vector<8x128xf32>
    %184 = tpu.matmul %183, %0, %cst_48 {dimension_numbers = #tpu.dot_dimension_numbers<[1], [0], [0], [1], [0, 0, 1, 1], [], []>} : vector<8x32xbf16>, vector<32x128xbf16>, vector<8x128xf32> -> vector<8x128xf32>
    %185 = arith.addf %182, %184 : vector<8x128xf32>
    %186 = vector.broadcast %16 : vector<1x128xf32> to vector<8x128xf32>
    %187 = arith.mulf %185, %186 : vector<8x128xf32>
    %188 = math.tanh %187 : vector<8x128xf32>
    %189 = vector.extract_strided_slice %188 {offsets = [0, 0], sizes = [8, 32], strides = [1, 1]} : vector<8x128xf32> to vector<8x32xf32>
    %cst_49 = arith.constant 5.000000e-01 : f32
    %190 = vector.broadcast %cst_49 : f32 to vector<8x32xf32>
    %191 = arith.mulf %190, %189 : vector<8x32xf32>
    %cst_50 = arith.constant 5.000000e-01 : f32
    %192 = vector.broadcast %cst_50 : f32 to vector<8x32xf32>
    %193 = arith.addf %191, %192 : vector<8x32xf32>
    %194 = vector.extract_strided_slice %188 {offsets = [0, 32], sizes = [8, 32], strides = [1, 1]} : vector<8x128xf32> to vector<8x32xf32>
    %cst_51 = arith.constant 5.000000e-01 : f32
    %195 = vector.broadcast %cst_51 : f32 to vector<8x32xf32>
    %196 = arith.mulf %195, %194 : vector<8x32xf32>
    %cst_52 = arith.constant 5.000000e-01 : f32
    %197 = vector.broadcast %cst_52 : f32 to vector<8x32xf32>
    %198 = arith.addf %196, %197 : vector<8x32xf32>
    %199 = vector.extract_strided_slice %188 {offsets = [0, 64], sizes = [8, 32], strides = [1, 1]} : vector<8x128xf32> to vector<8x32xf32>
    %200 = vector.extract_strided_slice %188 {offsets = [0, 96], sizes = [8, 32], strides = [1, 1]} : vector<8x128xf32> to vector<8x32xf32>
    %cst_53 = arith.constant 5.000000e-01 : f32
    %201 = vector.broadcast %cst_53 : f32 to vector<8x32xf32>
    %202 = arith.mulf %201, %200 : vector<8x32xf32>
    %cst_54 = arith.constant 5.000000e-01 : f32
    %203 = vector.broadcast %cst_54 : f32 to vector<8x32xf32>
    %204 = arith.addf %202, %203 : vector<8x32xf32>
    %205 = arith.mulf %198, %178 : vector<8x32xf32>
    %206 = arith.mulf %193, %199 : vector<8x32xf32>
    %207 = arith.addf %205, %206 : vector<8x32xf32>
    %208 = math.tanh %207 : vector<8x32xf32>
    %209 = arith.mulf %204, %208 : vector<8x32xf32>
    %210 = vector.extract_strided_slice %7 {offsets = [0, 7, 0], sizes = [8, 1, 128], strides = [1, 1, 1]} : vector<8x8x128xf32> to vector<8x1x128xf32>
    %211 = vector.shape_cast %210 : vector<8x1x128xf32> to vector<8x128xf32>
    %212 = arith.truncf %209 : vector<8x32xf32> to vector<8x32xbf16>
    %cst_55 = arith.constant dense<0.000000e+00> : vector<8x128xf32>
    %213 = tpu.matmul %212, %0, %cst_55 {dimension_numbers = #tpu.dot_dimension_numbers<[1], [0], [0], [1], [0, 0, 1, 1], [], []>} : vector<8x32xbf16>, vector<32x128xbf16>, vector<8x128xf32> -> vector<8x128xf32>
    %214 = arith.addf %211, %213 : vector<8x128xf32>
    %215 = vector.broadcast %16 : vector<1x128xf32> to vector<8x128xf32>
    %216 = arith.mulf %214, %215 : vector<8x128xf32>
    %217 = math.tanh %216 : vector<8x128xf32>
    %218 = vector.extract_strided_slice %217 {offsets = [0, 0], sizes = [8, 32], strides = [1, 1]} : vector<8x128xf32> to vector<8x32xf32>
    %cst_56 = arith.constant 5.000000e-01 : f32
    %219 = vector.broadcast %cst_56 : f32 to vector<8x32xf32>
    %220 = arith.mulf %219, %218 : vector<8x32xf32>
    %cst_57 = arith.constant 5.000000e-01 : f32
    %221 = vector.broadcast %cst_57 : f32 to vector<8x32xf32>
    %222 = arith.addf %220, %221 : vector<8x32xf32>
    %223 = vector.extract_strided_slice %217 {offsets = [0, 32], sizes = [8, 32], strides = [1, 1]} : vector<8x128xf32> to vector<8x32xf32>
    %cst_58 = arith.constant 5.000000e-01 : f32
    %224 = vector.broadcast %cst_58 : f32 to vector<8x32xf32>
    %225 = arith.mulf %224, %223 : vector<8x32xf32>
    %cst_59 = arith.constant 5.000000e-01 : f32
    %226 = vector.broadcast %cst_59 : f32 to vector<8x32xf32>
    %227 = arith.addf %225, %226 : vector<8x32xf32>
    %228 = vector.extract_strided_slice %217 {offsets = [0, 64], sizes = [8, 32], strides = [1, 1]} : vector<8x128xf32> to vector<8x32xf32>
    %229 = vector.extract_strided_slice %217 {offsets = [0, 96], sizes = [8, 32], strides = [1, 1]} : vector<8x128xf32> to vector<8x32xf32>
    %cst_60 = arith.constant 5.000000e-01 : f32
    %230 = vector.broadcast %cst_60 : f32 to vector<8x32xf32>
    %231 = arith.mulf %230, %229 : vector<8x32xf32>
    %cst_61 = arith.constant 5.000000e-01 : f32
    %232 = vector.broadcast %cst_61 : f32 to vector<8x32xf32>
    %233 = arith.addf %231, %232 : vector<8x32xf32>
    %234 = arith.mulf %227, %207 : vector<8x32xf32>
    %235 = arith.mulf %222, %228 : vector<8x32xf32>
    %236 = arith.addf %234, %235 : vector<8x32xf32>
    %237 = math.tanh %236 : vector<8x32xf32>
    %238 = arith.mulf %233, %237 : vector<8x32xf32>
    %239 = arith.truncf %238 : vector<8x32xf32> to vector<8x32xbf16>
    %c0_62 = arith.constant 0 : index
    %c0_63 = arith.constant 0 : index
    %240 = vector.load %arg5[%c0_62, %c0_63] : memref<32x32xbf16, #tpu.memory_space<vmem>>, vector<32x32xbf16>
    %cst_64 = arith.constant dense<0.000000e+00> : vector<8x32xf32>
    %241 = tpu.matmul %239, %240, %cst_64 {dimension_numbers = #tpu.dot_dimension_numbers<[1], [0], [0], [1], [0, 0, 1, 1], [], []>} : vector<8x32xbf16>, vector<32x32xbf16>, vector<8x32xf32> -> vector<8x32xf32>
    %c0_65 = arith.constant 0 : index
    %c0_66 = arith.constant 0 : index
    %242 = vector.load %arg6[%c0_65, %c0_66] : memref<1x32xf32, #tpu.memory_space<vmem>>, vector<1x32xf32>
    %243 = vector.broadcast %242 : vector<1x32xf32> to vector<8x32xf32>
    %244 = arith.addf %241, %243 : vector<8x32xf32>
    %c0_67 = arith.constant 0 : index
    %c0_68 = arith.constant 0 : index
    %245 = vector.load %arg7[%c0_67, %c0_68] : memref<8x32xf32, #tpu.memory_space<vmem>>, vector<8x32xf32>
    tpu.vector_store %arg7[%c0_67, %c0_68], %244 {strides = array<i32>} : memref<8x32xf32, #tpu.memory_space<vmem>>, vector<8x32xf32>,
    return
  }
  func.func @transform_0(%arg0: i32) -> (i32, i32) {
    %c0_i32 = arith.constant 0 : i32
    %c0_i32_0 = arith.constant 0 : i32
    return %arg0, %c0_i32 : i32, i32
  }
  func.func @transform_1(%arg0: i32) -> (i32, i32) {
    %c0_i32 = arith.constant 0 : i32
    %c0_i32_0 = arith.constant 0 : i32
    %c0_i32_1 = arith.constant 0 : i32
    return %c0_i32, %c0_i32_0 : i32, i32
  }
  func.func @transform_2(%arg0: i32) -> (i32, i32) {
    %c0_i32 = arith.constant 0 : i32
    %c0_i32_0 = arith.constant 0 : i32
    %c0_i32_1 = arith.constant 0 : i32
    return %c0_i32, %c0_i32_0 : i32, i32
  }
  func.func @transform_3(%arg0: i32) -> (i32, i32) {
    %c0_i32 = arith.constant 0 : i32
    %c0_i32_0 = arith.constant 0 : i32
    %c0_i32_1 = arith.constant 0 : i32
    return %c0_i32, %c0_i32_0 : i32, i32
  }
  func.func @transform_4(%arg0: i32) -> (i32, i32) {
    %c0_i32 = arith.constant 0 : i32
    %c0_i32_0 = arith.constant 0 : i32
    %c0_i32_1 = arith.constant 0 : i32
    return %c0_i32, %c0_i32_0 : i32, i32
  }
  func.func @transform_5(%arg0: i32) -> (i32, i32) {
    %c0_i32 = arith.constant 0 : i32
    %c0_i32_0 = arith.constant 0 : i32
    %c0_i32_1 = arith.constant 0 : i32
    return %c0_i32, %c0_i32_0 : i32, i32
  }
  func.func @transform_6(%arg0: i32) -> (i32, i32) {
    %c0_i32 = arith.constant 0 : i32
    %c0_i32_0 = arith.constant 0 : i32
    return %arg0, %c0_i32 : i32, i32
  }
}

</mosaic_0001>

<bundles_post_ra>
// kernel: _trajectory_encoder_impl.1
= control target key start
LH: loop header
LB: loop body
LE: loop exit
PB: predicated region body
PF: predicated region fallthrough
CT: control target
= control target key end

     0   :  { %vm79_vm0 = vcmask 261120   ;;  %v157_v6 = vlaneseq  ;;  %v2934_v10 = vmov 0.5   ;;  %vm2938_vm4 = vmmov 0   ;;  %s2939_s14 = smov 32   ;;  %s4017_s1 = inlined_call_operand.vmem [shape: bf16[32,128], index: 1, kind: input, shape index: {}]   ;;  %s4018_s0 = inlined_call_operand.vmem [shape: bf16[64,32], index: 0, kind: input, shape index: {}]   ;;  %s4019_s3 = inlined_call_operand.vmem [shape: f32[1,128], index: 3, kind: input, shape index: {}]   ;;  %s4020_s2 = inlined_call_operand.vmem [shape: bf16[32,128], index: 2, kind: input, shape index: {}]   ;;  %s4021_s4 = inlined_call_operand.vmem [shape: bf16[32,32], index: 4, kind: input, shape index: {}]   ;;  %s4022_s5 = inlined_call_operand.vmem [shape: f32[1,32], index: 5, kind: input, shape index: {}]   ;;  %s4023_s6 = inlined_call_operand.vmem [shape: f32[8,32], index: 6, kind: output, shape index: {}]  }
   0x1   :  { %v2666_v0 = vld [vmem:[%s4017_s1] sm:$0xff]   ;;  %v2667_v1 = vld [vmem:[%s4017_s1 + $0x8] sm:$0xff]   ;;  %v2670_v4 = vld [vmem:[%s4018_s0 + $0x10] sm:$0xff]   ;;  %vm308_vm5 = vcmask 1041409   ;;  %vm311_vm6 = vcmask 1042434   ;;  %vm314_vm7 = vcmask 1043459  }
   0x2   :  { %2584 = vmatprep.subr.bf16.mxu0 %v2666_v0  ;;  %v2668_v2 = vld [vmem:[%s4018_s0] sm:$0xff]   ;;  %v2669_v3 = vld [vmem:[%s4018_s0 + $0x8] sm:$0xff]   ;;  %v2671_v5 = vld [vmem:[%s4018_s0 + $0x18] sm:$0xff]   ;;  %v158_v7 = vand.u32 127, %v157_v6  ;;  %s2935_s0 = smov 64   ;;  %vm317_vm8 = vcmask 1044484  }
   0x3   :  { %2585 = vmatpush3.bf16.msra.mxu0 %v2666_v0  ;;  %2588 = vmatprep.mubr.msk.bf16.mxu0 %vm79_vm0, %v2668_v2  ;;  %v2530_v8 = vld [vmem:[%s4019_s3] ss:$0 sm:$0xff]  ;;  %s2936_s3 = smov 96   ;;  %vm320_vm9 = vcmask 1045509   ;;  %vm323_vm10 = vcmask 1046534   ;;  %vm326_vm11 = vcmask 1047559  }
   0x4   :  { %2586 = vmatprep.subr.bf16.mxu0 %v2667_v1  ;;  %vm159_vm1 = vcmp.ge.s32.totalorder %v158_v7, 64  ;;  %vm160_vm2 = vcmp.lt.s32.totalorder %v158_v7, 96 }
   0x5   :  { %vm161_vm3 = vmand %vm159_vm1, %vm160_vm2 }
   0x6   :  { %v3000_v11 = vsel %vm161_vm3, 1.0, %v2934_v10 }
   0x7   :  { %2587 = vmatpush3.bf16.msra.mxu0 %v2667_v1 }
   0xa   :  { %2589 = vmatmul.mubr.msk.bf16.vlgmr.msra.gmra.mrb[0].mxu0 %vm79_vm0, %v2669_v3 }
   0xb   :  { %2592 = vmatprep.mubr.msk.bf16.mxu0 %vm79_vm0, %v2670_v4 }
  0x12   :  { %2593 = vmatmul.mubr.msk.bf16.gmra.mrb[4].mxu0 %vm79_vm0, %v2671_v5 }
  0xdd   :  { %v2590_v9 = vpop.f32.mrb[0].mxu0 }
  0xde   :  { %v3002_v12 = vadd.f32 %v2590_v9, %v2530_v8  ;;  %v126_v13 = vpop.f32.mrb[1].mxu0 }
  0xdf   :  { %v3004_v14 = vadd.f32 %v2530_v8, %v126_v13  ;;  %v2591_v15 = vpop.f32.mrb[2].mxu0 }
  0xe0   :  { %v3006_v16 = vadd.f32 %v2591_v15, %v2530_v8  ;;  %v129_v17 = vpop.f32.mrb[3].mxu0  ;;  %v165_v18 = vmul.f32 %v3000_v11, %v3002_v12 }
  0xe1   :  { %v3010_v19 = vadd.f32 %v2530_v8, %v129_v17  ;;  %v163_v20 = vmul.f32 %v3000_v11, %v3004_v14 }
  0xe2   :  { %2676 = vtanh.f32 %v165_v18  ;;  %v166_v22 = vmul.f32 %v3000_v11, %v3006_v16 }
  0xe3   :  { %2678 = vtanh.f32 %v163_v20  ;;  %v164_v21 = vmul.f32 %v3000_v11, %v3010_v19 }
  0xe5   :  { %v2594_v23 = vpop.f32.mrb[4].mxu0  ;;  %2680 = vtanh.f32 %v164_v21 }
  0xe6   :  { %v142_v24 = vpop.f32.mrb[5].mxu0  ;;  %v3018_v25 = vadd.f32 %v2594_v23, %v2530_v8  ;;  %2682 = vtanh.f32 %v166_v22 }
  0xe7   :  { %v3020_v26 = vadd.f32 %v2530_v8, %v142_v24  ;;  %v2595_v27 = vpop.f32.mrb[6].mxu0  ;;  %v2937_v24 = vmov 0.0  }
  0xe8   :  { %v145_v28 = vpop.f32.mrb[7].mxu0  ;;  %v3022_v29 = vadd.f32 %v2595_v27, %v2530_v8  ;;  %v169_v33 = vmul.f32 %v3000_v11, %v3018_v25  ;;  %2596 = vmatprep.subr.bf16.mxu1 %v2937_v24  ;;  %v3094_v27 = vld [vmem:[%s4020_s2] sm:$0xff]   ;;  %2600 = vmatprep.mubr.msk.bf16.mxu1 %vm2938_vm4, %v2937_v24 }
  0xe9   :  { %v3024_v30 = vadd.f32 %v2530_v8, %v145_v28  ;;  %v167_v31 = vmul.f32 %v3000_v11, %v3020_v26  ;;  %2612 = vmatprep.subr.bf16.mxu0 %v2937_v24  ;;  %2597 = vmatpush3.bf16.msra.mxu1 %v3094_v27  ;;  %v3103_v28 = vld [vmem:[%s4020_s2 + $0x8] sm:$0xff]  }
  0xea   :  { %v170_v36 = vmul.f32 %v3000_v11, %v3022_v29  ;;  %2613 = vmatpush3.bf16.msra.mxu0 %v3094_v27  ;;  %2598 = vmatprep.subr.bf16.mxu1 %v2937_v24 }
  0xeb   :  { %2684 = vtanh.f32 %v167_v31  ;;  %v168_v32 = vmul.f32 %v3000_v11, %v3024_v30  ;;  %2614 = vmatprep.subr.bf16.mxu0 %v2937_v24  ;;  %2616 = vmatprep.mubr.msk.bf16.mxu0 %vm2938_vm4, %v2937_v24 }
  0xec   :  { %v2677_v34 = vpop.eup %2676 }
  0xed   :  { %v2679_v35 = vpop.eup %2678  ;;  %207 = vrot.lane.b32.xlu0 %v2677_v34, %s2935_s0  ;;  %2686 = vtanh.f32 %v168_v32  ;;  %v181_v43 = vmul.f32 0.5, %v2677_v34  ;;  %2599 = vmatpush3.bf16.msra.mxu1 %v3103_v28 }
  0xee   :  { %203 = vrot.lane.b32.xlu1 %v2679_v35, %s2935_s0  ;;  %2688 = vtanh.f32 %v169_v33  ;;  %v179_v44 = vmul.f32 0.5, %v2679_v35  ;;  %2615 = vmatpush3.bf16.msra.mxu0 %v3103_v28 }
  0xef   :  { %v2681_v37 = vpop.eup %2680  ;;  %2690 = vtanh.f32 %v170_v36  ;;  %v3042_v45 = vadd.f32 0.5, %v181_v43  ;;  %2604 = vmatprep.subr.bf16.mxu1 %v2937_v24  ;;  %2628 = vmatprep.subr.bf16.mxu0 %v2937_v24 }
  0xf0   :  { %v2683_v38 = vpop.eup %2682  ;;  %v180_v46 = vmul.f32 0.5, %v2681_v37  ;;  %v3044_v48 = vadd.f32 0.5, %v179_v44 }
  0xf1   :  { %205 = vrot.lane.b32.xlu0 %v2681_v37, %s2935_s0  ;;  %v182_v49 = vmul.f32 0.5, %v2683_v38 }
  0xf2   :  { %209 = vrot.lane.b32.xlu1 %v2683_v38, %s2935_s0  ;;  %v3053_v53 = vadd.f32 0.5, %v180_v46 }
  0xf3   :  { %v3056_v55 = vadd.f32 0.5, %v182_v49 }
  0xf5   :  { %v2685_v39 = vpop.eup %2684 }
  0xf6   :  { %211 = vrot.lane.b32.xlu0 %v2685_v39, %s2935_s0  ;;  %v183_v56 = vmul.f32 0.5, %v2685_v39 }
  0xf7   :  { %v2687_v40 = vpop.eup %2686 }
  0xf8   :  { %213 = vrot.lane.b32.xlu1 %v2687_v40, %s2935_s0  ;;  %v2689_v41 = vpop.eup %2688  ;;  %v184_v60 = vmul.f32 0.5, %v2687_v40  ;;  %v3066_v61 = vadd.f32 0.5, %v183_v56 }
  0xf9   :  { %v2691_v42 = vpop.eup %2690  ;;  %v185_v62 = vmul.f32 0.5, %v2689_v41 }
  0xfa   :  { %215 = vrot.lane.b32.xlu0 %v2689_v41, %s2935_s0  ;;  %v3071_v1 = vadd.f32 0.5, %v184_v60  ;;  %v186_v2 = vmul.f32 0.5, %v2691_v42 }
  0xfb   :  { %v3077_v5 = vadd.f32 0.5, %v185_v62 }
  0xfc   :  { %217 = vrot.lane.b32.xlu1 %v2691_v42, %s2935_s0  ;;  %v3083_v10 = vadd.f32 0.5, %v186_v2 }
 0x15f   :  { %v208_v47 = vpop.permute.xlu0 %207 }
 0x160   :  { %v3047_v50 = vmul.f32 %v208_v47, %v3042_v45  ;;  %v204_v51 = vpop.permute.xlu1 %203 }
 0x161   :  { %v3050_v52 = vmul.f32 %v204_v51, %v3044_v48 }
 0x162   :  { %2692 = vtanh.f32 %v3047_v50 }
 0x163   :  { %2694 = vtanh.f32 %v3050_v52  ;;  %v206_v54 = vpop.permute.xlu0 %205 }
 0x164   :  { %v3059_v57 = vmul.f32 %v206_v54, %v3053_v53  ;;  %v210_v58 = vpop.permute.xlu1 %209 }
 0x165   :  { %v3062_v59 = vmul.f32 %v210_v58, %v3056_v55 }
 0x166   :  { %2696 = vtanh.f32 %v3059_v57 }
 0x167   :  { %2698 = vtanh.f32 %v3062_v59 }
 0x168   :  { %v212_v63 = vpop.permute.xlu0 %211 }
 0x169   :  { %v3069_v0 = vmul.f32 %v212_v63, %v3066_v61 }
 0x16a   :  { %v214_v3 = vpop.permute.xlu1 %213 }
 0x16b   :  { %2700 = vtanh.f32 %v3069_v0  ;;  %v3075_v4 = vmul.f32 %v214_v3, %v3071_v1 }
 0x16c   :  { %v2693_v6 = vpop.eup %2692  ;;  %v216_v7 = vpop.permute.xlu0 %215 }
 0x16d   :  { %v2695_v8 = vpop.eup %2694  ;;  %2702 = vtanh.f32 %v3075_v4  ;;  %v3081_v9 = vmul.f32 %v216_v7, %v3077_v5  ;;  %255 = vrot.lane.b32.xlu1 %v2693_v6, %s2936_s3 }
 0x16e   :  { %v218_v13 = vpop.permute.xlu1 %217  ;;  %251 = vrot.lane.b32.xlu0 %v2695_v8, %s2936_s3 }
 0x16f   :  { %2704 = vtanh.f32 %v3081_v9  ;;  %v3087_v15 = vmul.f32 %v218_v13, %v3083_v10 }
 0x170   :  { %v2697_v17 = vpop.eup %2696 }
 0x171   :  { %v2699_v18 = vpop.eup %2698  ;;  %2706 = vtanh.f32 %v3087_v15 }
 0x172   :  { %257 = vrot.lane.b32.xlu1 %v2699_v18, %s2936_s3  ;;  %253 = vrot.lane.b32.xlu0 %v2697_v17, %s2936_s3 }
 0x175   :  { %v2701_v20 = vpop.eup %2700 }
 0x176   :  { %259 = vrot.lane.b32.xlu0 %v2701_v20, %s2936_s3 }
 0x177   :  { %v2703_v21 = vpop.eup %2702 }
 0x178   :  { %261 = vrot.lane.b32.xlu1 %v2703_v21, %s2936_s3 }
 0x179   :  { %v2705_v22 = vpop.eup %2704 }
 0x17a   :  { %263 = vrot.lane.b32.xlu0 %v2705_v22, %s2936_s3 }
 0x17b   :  { %v2707_v23 = vpop.eup %2706 }
 0x17c   :  { %265 = vrot.lane.b32.xlu1 %v2707_v23, %s2936_s3 }
 0x1df   :  { %v256_v31 = vpop.permute.xlu1 %255 }
 0x1e0   :  { %v277_v32 = vmul.f32 %v256_v31, %v3042_v45  ;;  %v252_v33 = vpop.permute.xlu0 %251 }
 0x1e1   :  { %v275_v34 = vmul.f32 %v252_v33, %v3044_v48 }
 0x1e2   :  { %v285_v35 = vpack.c.bf16 %v277_v32, %v277_v32 }
 0x1e3   :  { %v283_v40 = vpack.c.bf16 %v275_v34, %v275_v34 }
 0x1e4   :  { %v258_v36 = vpop.permute.xlu1 %257  ;;  %v254_v37 = vpop.permute.xlu0 %253  ;;  %v301_v43 = vunpack.c.l.b16 %v285_v35 }
 0x1e5   :  { %v278_v38 = vmul.f32 %v258_v36, %v3056_v55  ;;  %v276_v39 = vmul.f32 %v254_v37, %v3053_v53  ;;  %v299_v48 = vunpack.c.l.b16 %v283_v40 }
 0x1e6   :  { %v310_v55 = vrot.slane %v301_v43, 6 }
 0x1e7   :  { %v286_v41 = vpack.c.bf16 %v278_v38, %v278_v38  ;;  %v284_v42 = vpack.c.bf16 %v276_v39, %v276_v39 }
 0x1e8   :  { %v260_v44 = vpop.permute.xlu0 %259 }
 0x1e9   :  { %v302_v46 = vunpack.c.l.b16 %v286_v41  ;;  %v300_v47 = vunpack.c.l.b16 %v284_v42  ;;  %v279_v49 = vmul.f32 %v260_v44, %v3066_v61 }
 0x1ea   :  { %v262_v45 = vpop.permute.xlu1 %261 }
 0x1eb   :  { %v307_v51 = vrot.slane %v300_v47, 7  ;;  %v287_v54 = vpack.c.bf16 %v279_v49, %v279_v49  ;;  %v280_v56 = vmul.f32 %v262_v45, %v3071_v1  ;;  %v313_v58 = vrot.slane %v302_v46, 5 }
 0x1ec   :  { %v264_v53 = vpop.permute.xlu0 %263 }
 0x1ed   :  { %v309_v60 = vsel %vm308_vm5, %v307_v51, %v299_v48  ;;  %v303_v62 = vunpack.c.l.b16 %v287_v54  ;;  %v288_v63 = vpack.c.bf16 %v280_v56, %v280_v56  ;;  %v281_v2 = vmul.f32 %v264_v53, %v3077_v5 }
 0x1ee   :  { %v312_v61 = vsel %vm311_vm6, %v310_v55, %v309_v60  ;;  %v266_v3 = vpop.permute.xlu1 %265 }
 0x1ef   :  { %v315_v6 = vsel %vm314_vm7, %v313_v58, %v312_v61  ;;  %v316_v7 = vrot.slane %v303_v62, 4  ;;  %v304_v8 = vunpack.c.l.b16 %v288_v63  ;;  %v289_v13 = vpack.c.bf16 %v281_v2, %v281_v2 }
 0x1f0   :  { %v282_v1 = vmul.f32 %v266_v3, %v3083_v10 }
 0x1f1   :  { %v318_v17 = vsel %vm317_vm8, %v316_v7, %v315_v6  ;;  %v319_v18 = vrot.slane %v304_v8, 3  ;;  %v305_v20 = vunpack.c.l.b16 %v289_v13 }
 0x1f2   :  { %v290_v21 = vpack.c.bf16 %v282_v1, %v282_v1 }
 0x1f3   :  { %v321_v5 = vsel %vm320_vm9, %v319_v18, %v318_v17  ;;  %v322_v22 = vrot.slane %v305_v20, 2 }
 0x1f4   :  { %v306_v23 = vunpack.c.l.b16 %v290_v21  ;;  %v450_v21 = vrot.slane %v3050_v52, 7  ;;  %v455_v52 = vrot.slane %v3075_v4, 7 }
 0x1f5   :  { %v324_v31 = vsel %vm323_vm10, %v322_v22, %v321_v5  ;;  %v452_v5 = vrot.slane %v3047_v50, 7  ;;  %v451_v22 = vrot.slane %v3059_v57, 7  ;;  %v457_v50 = vrot.slane %v3087_v15, 7 }
 0x1f6   :  { %v325_v32 = vrot.slane %v306_v23, 1  ;;  %v453_v23 = vrot.slane %v3062_v59, 7 }
 0x1f8   :  { %v327_v33 = vsel %vm326_vm11, %v325_v32, %v324_v31  ;;  %v456_v31 = vrot.slane %v3081_v9, 7  ;;  %v454_v32 = vrot.slane %v3069_v0, 7 }
 0x1f9   :  { %v328_v34 = vpack.c.b16 %v327_v33, %v327_v33 }
 0x1fb   :  { %329 = vrot.lane.b32.xlu0 %v328_v34, %s2939_s14 }
 0x26d   :  { %v330_v10 = vpop.permute.xlu0 %329 }
 0x26e   :  { %2601 = vmatmul.mubr.msk.bf16.vlgmr.msra.gmra.mrb[0].mxu1 %vm79_vm0, %v330_v10 }
 0x26f   :  { %2605 = vmatpush3.bf16.msra.mxu1 %v3094_v27  ;;  %2608 = vmatprep.mubr.msk.bf16.mxu1 %vm2938_vm4, %v2937_v24 }
 0x270   :  { %2606 = vmatprep.subr.bf16.mxu1 %v2937_v24 }
 0x273   :  { %2607 = vmatpush3.bf16.msra.mxu1 %v3103_v28 }
 0x274   :  { %2620 = vmatprep.subr.bf16.mxu1 %v2937_v24 }
 0x341   :  { %v380_v35 = vpop.f32.mrb[0].mxu1 }
 0x342   :  { %v387_v36 = vrot.slane %v380_v35, 7  ;;  %v388_v37 = vrot.slane %v380_v35, 1  ;;  %v389_v38 = vrot.slane %v380_v35, 2  ;;  %v2602_v39 = vpop.f32.mrb[1].mxu1  ;;  %v390_v40 = vrot.slane %v380_v35, 3 }
 0x343   :  { %v403_v41 = vadd.f32 %v380_v35, %v3010_v19  ;;  %v383_v42 = vpop.f32.mrb[2].mxu1  ;;  %v391_v43 = vrot.slane %v380_v35, 4  ;;  %v392_v51 = vrot.slane %v380_v35, 5  ;;  %v393_v55 = vrot.slane %v380_v35, 6 }
 0x344   :  { %v402_v44 = vadd.f32 %v387_v36, %v3004_v14  ;;  %v404_v46 = vadd.f32 %v388_v37, %v3002_v12  ;;  %v405_v47 = vadd.f32 %v389_v38, %v3006_v16  ;;  %v2603_v49 = vpop.f32.mrb[3].mxu1  ;;  %v406_v54 = vadd.f32 %v390_v40, %v3020_v26 }
 0x345   :  { %v411_v45 = vmul.f32 %v403_v41, %v3000_v11  ;;  %v407_v58 = vadd.f32 %v391_v43, %v3024_v30  ;;  %v408_v60 = vadd.f32 %v392_v51, %v3018_v25  ;;  %v409_v63 = vadd.f32 %v393_v55, %v3022_v29 }
 0x346   :  { %v412_v48 = vmul.f32 %v404_v46, %v3000_v11  ;;  %v410_v56 = vmul.f32 %v402_v44, %v3000_v11  ;;  %v413_v53 = vmul.f32 %v405_v47, %v3000_v11  ;;  %v414_v62 = vmul.f32 %v406_v54, %v3000_v11 }
 0x347   :  { %2708 = vtanh.f32 %v411_v45  ;;  %v415_v2 = vmul.f32 %v407_v58, %v3000_v11  ;;  %v416_v61 = vmul.f32 %v408_v60, %v3000_v11  ;;  %v417_v3 = vmul.f32 %v409_v63, %v3000_v11 }
 0x348   :  { %2710 = vtanh.f32 %v412_v48 }
 0x349   :  { %2712 = vtanh.f32 %v410_v56 }
 0x34a   :  { %2714 = vtanh.f32 %v413_v53 }
 0x34b   :  { %2716 = vtanh.f32 %v414_v62 }
 0x34c   :  { %2718 = vtanh.f32 %v415_v2 }
 0x34d   :  { %2720 = vtanh.f32 %v416_v61 }
 0x34e   :  { %2722 = vtanh.f32 %v417_v3 }
 0x351   :  { %v2709_v6 = vpop.eup %2708 }
 0x352   :  { %v2711_v7 = vpop.eup %2710  ;;  %500 = vrot.lane.b32.xlu1 %v2709_v6, %s2935_s0  ;;  %v427_v57 = vmul.f32 0.5, %v2709_v6 }
 0x353   :  { %502 = vrot.lane.b32.xlu0 %v2711_v7, %s2935_s0  ;;  %v2713_v8 = vpop.eup %2712  ;;  %v428_v35 = vmul.f32 0.5, %v2711_v7 }
 0x354   :  { %v2715_v13 = vpop.eup %2714  ;;  %v3177_v59 = vadd.f32 0.5, %v427_v57  ;;  %v426_v33 = vmul.f32 0.5, %v2713_v8 }
 0x355   :  { %v2717_v1 = vpop.eup %2716  ;;  %v429_v9 = vmul.f32 0.5, %v2715_v13  ;;  %v3187_v41 = vadd.f32 0.5, %v428_v35 }
 0x356   :  { %498 = vrot.lane.b32.xlu1 %v2713_v8, %s2935_s0  ;;  %v2719_v17 = vpop.eup %2718  ;;  %v3181_v36 = vadd.f32 0.5, %v426_v33  ;;  %v430_v37 = vmul.f32 0.5, %v2717_v1 }
 0x357   :  { %504 = vrot.lane.b32.xlu0 %v2715_v13, %s2935_s0  ;;  %v2721_v18 = vpop.eup %2720  ;;  %v3183_v4 = vadd.f32 0.5, %v429_v9  ;;  %v431_v46 = vmul.f32 0.5, %v2719_v17 }
 0x358   :  { %v2723_v20 = vpop.eup %2722  ;;  %v432_v42 = vmul.f32 0.5, %v2721_v18  ;;  %v3190_v43 = vadd.f32 0.5, %v430_v37 }
 0x359   :  { %v3198_v51 = vadd.f32 0.5, %v431_v46  ;;  %v433_v56 = vmul.f32 0.5, %v2723_v20 }
 0x35a   :  { %506 = vrot.lane.b32.xlu1 %v2717_v1, %s2935_s0  ;;  %v3196_v48 = vadd.f32 0.5, %v432_v42 }
 0x35b   :  { %508 = vrot.lane.b32.xlu0 %v2719_v17, %s2935_s0  ;;  %v3204_v60 = vadd.f32 0.5, %v433_v56 }
 0x35e   :  { %510 = vrot.lane.b32.xlu1 %v2721_v18, %s2935_s0 }
 0x35f   :  { %512 = vrot.lane.b32.xlu0 %v2723_v20, %s2935_s0 }
 0x362   :  { %458 = vrot.lane.b32.xlu1 %v450_v21, %s2939_s14 }
 0x363   :  { %462 = vrot.lane.b32.xlu0 %v452_v5, %s2939_s14 }
 0x366   :  { %460 = vrot.lane.b32.xlu1 %v451_v22, %s2939_s14 }
 0x367   :  { %464 = vrot.lane.b32.xlu0 %v453_v23, %s2939_s14 }
 0x36a   :  { %470 = vrot.lane.b32.xlu1 %v456_v31, %s2939_s14 }
 0x36b   :  { %466 = vrot.lane.b32.xlu0 %v454_v32, %s2939_s14 }
 0x36e   :  { %472 = vrot.lane.b32.xlu1 %v457_v50, %s2939_s14 }
 0x36f   :  { %468 = vrot.lane.b32.xlu0 %v455_v52, %s2939_s14 }
 0x3c4   :  { %v501_v34 = vpop.permute.xlu1 %500 }
 0x3c5   :  { %v523_v0 = vmul.f32 %v501_v34, %v3177_v59  ;;  %v503_v10 = vpop.permute.xlu0 %502 }
 0x3c6   :  { %v524_v47 = vmul.f32 %v503_v10, %v3187_v41 }
 0x3c7   :  { %540 = vrot.lane.b32.xlu1 %v523_v0, %s2939_s14 }
 0x3c8   :  { %v499_v15 = vpop.permute.xlu1 %498 }
 0x3c9   :  { %v522_v38 = vmul.f32 %v499_v15, %v3181_v36  ;;  %v505_v39 = vpop.permute.xlu0 %504 }
 0x3ca   :  { %v525_v40 = vmul.f32 %v505_v39, %v3183_v4 }
 0x3cb   :  { %538 = vrot.lane.b32.xlu1 %v522_v38, %s2939_s14 }
 0x3cc   :  { %v507_v44 = vpop.permute.xlu1 %506  ;;  %544 = vrot.lane.b32.xlu0 %v525_v40, %s2939_s14 }
 0x3cd   :  { %v509_v49 = vpop.permute.xlu0 %508  ;;  %v526_v45 = vmul.f32 %v507_v44, %v3190_v43 }
 0x3ce   :  { %v527_v58 = vmul.f32 %v509_v49, %v3198_v51 }
 0x3cf   :  { %542 = vrot.lane.b32.xlu1 %v524_v47, %s2939_s14 }
 0x3d0   :  { %v511_v54 = vpop.permute.xlu1 %510  ;;  %546 = vrot.lane.b32.xlu0 %v526_v45, %s2939_s14 }
 0x3d1   :  { %v528_v55 = vmul.f32 %v511_v54, %v3196_v48  ;;  %v513_v53 = vpop.permute.xlu0 %512 }
 0x3d2   :  { %v529_v62 = vmul.f32 %v513_v53, %v3204_v60 }
 0x3d3   :  { %550 = vrot.lane.b32.xlu1 %v528_v55, %s2939_s14 }
 0x3d4   :  { %548 = vrot.lane.b32.xlu0 %v527_v58, %s2939_s14  ;;  %v459_v63 = vpop.permute.xlu1 %458 }
 0x3d5   :  { %v463_v2 = vpop.permute.xlu0 %462  ;;  %v482_v20 = vmul.f32 %v459_v63, %v3181_v36 }
 0x3d6   :  { %v484_v23 = vmul.f32 %v463_v2, %v3187_v41 }
 0x3d8   :  { %552 = vrot.lane.b32.xlu0 %v529_v62, %s2939_s14  ;;  %v461_v61 = vpop.permute.xlu1 %460 }
 0x3d9   :  { %v465_v3 = vpop.permute.xlu0 %464  ;;  %v483_v13 = vmul.f32 %v461_v61, %v3177_v59 }
 0x3da   :  { %v485_v50 = vmul.f32 %v465_v3, %v3183_v4 }
 0x3dc   :  { %v471_v6 = vpop.permute.xlu1 %470 }
 0x3dd   :  { %v467_v7 = vpop.permute.xlu0 %466  ;;  %v488_v34 = vmul.f32 %v471_v6, %v3196_v48 }
 0x3de   :  { %v486_v31 = vmul.f32 %v467_v7, %v3190_v43 }
 0x3e0   :  { %v473_v8 = vpop.permute.xlu1 %472 }
 0x3e1   :  { %v469_v17 = vpop.permute.xlu0 %468  ;;  %v489_v40 = vmul.f32 %v473_v8, %v3204_v60 }
 0x3e2   :  { %v487_v35 = vmul.f32 %v469_v17, %v3198_v51 }
 0x439   :  { %v541_v1 = vpop.permute.xlu1 %540 }
 0x43a   :  { %v3210_v18 = vadd.f32 %v541_v1, %v483_v13 }
 0x43c   :  { %2724 = vtanh.f32 %v3210_v18 }
 0x43d   :  { %v539_v21 = vpop.permute.xlu1 %538 }
 0x43e   :  { %v3214_v5 = vadd.f32 %v539_v21, %v482_v20  ;;  %v545_v22 = vpop.permute.xlu0 %544 }
 0x43f   :  { %v3225_v9 = vadd.f32 %v545_v22, %v485_v50 }
 0x440   :  { %2726 = vtanh.f32 %v3214_v5 }
 0x441   :  { %v543_v32 = vpop.permute.xlu1 %542 }
 0x442   :  { %v3220_v52 = vadd.f32 %v543_v32, %v484_v23  ;;  %v547_v57 = vpop.permute.xlu0 %546 }
 0x443   :  { %v3222_v33 = vadd.f32 %v547_v57, %v486_v31 }
 0x444   :  { %2728 = vtanh.f32 %v3220_v52 }
 0x445   :  { %2730 = vtanh.f32 %v3222_v33  ;;  %v551_v0 = vpop.permute.xlu1 %550 }
 0x446   :  { %v2725_v10 = vpop.eup %2724  ;;  %v3230_v15 = vadd.f32 %v551_v0, %v488_v34  ;;  %v549_v37 = vpop.permute.xlu0 %548  ;;  %2732 = vtanh.f32 %v3225_v9 }
 0x447   :  { %588 = vrot.lane.b32.xlu1 %v2725_v10, %s2935_s0  ;;  %v3234_v38 = vadd.f32 %v549_v37, %v487_v35 }
 0x448   :  { %2734 = vtanh.f32 %v3230_v15 }
 0x449   :  { %2736 = vtanh.f32 %v3234_v38 }
 0x44a   :  { %v2727_v39 = vpop.eup %2726  ;;  %v553_v42 = vpop.permute.xlu0 %552 }
 0x44b   :  { %586 = vrot.lane.b32.xlu1 %v2727_v39, %s2935_s0  ;;  %v3240_v44 = vadd.f32 %v553_v42, %v489_v40 }
 0x44d   :  { %2738 = vtanh.f32 %v3240_v44 }
 0x44e   :  { %v2729_v46 = vpop.eup %2728 }
 0x44f   :  { %v2731_v47 = vpop.eup %2730  ;;  %590 = vrot.lane.b32.xlu0 %v2729_v46, %s2935_s0 }
 0x450   :  { %594 = vrot.lane.b32.xlu1 %v2731_v47, %s2935_s0  ;;  %v2733_v49 = vpop.eup %2732 }
 0x452   :  { %v2735_v45 = vpop.eup %2734 }
 0x453   :  { %592 = vrot.lane.b32.xlu0 %v2733_v49, %s2935_s0  ;;  %v2737_v54 = vpop.eup %2736 }
 0x454   :  { %598 = vrot.lane.b32.xlu1 %v2735_v45, %s2935_s0 }
 0x457   :  { %596 = vrot.lane.b32.xlu0 %v2737_v54, %s2935_s0  ;;  %v2739_v56 = vpop.eup %2738 }
 0x45b   :  { %600 = vrot.lane.b32.xlu0 %v2739_v56, %s2935_s0 }
 0x4b9   :  { %v589_v55 = vpop.permute.xlu1 %588 }
 0x4ba   :  { %v611_v2 = vmul.f32 %v589_v55, %v3177_v59 }
 0x4bc   :  { %v619_v1 = vpack.c.bf16 %v611_v2, %v611_v2 }
 0x4bd   :  { %v587_v58 = vpop.permute.xlu1 %586 }
 0x4be   :  { %v610_v53 = vmul.f32 %v587_v58, %v3181_v36  ;;  %v635_v50 = vunpack.c.l.b16 %v619_v1 }
 0x4c0   :  { %v618_v62 = vpack.c.bf16 %v610_v53, %v610_v53 }
 0x4c1   :  { %v591_v63 = vpop.permute.xlu0 %590 }
 0x4c2   :  { %v612_v61 = vmul.f32 %v591_v63, %v3187_v41  ;;  %v595_v3 = vpop.permute.xlu1 %594  ;;  %v634_v7 = vunpack.c.l.b16 %v618_v62 }
 0x4c3   :  { %v614_v6 = vmul.f32 %v595_v3, %v3190_v43 }
 0x4c4   :  { %v620_v8 = vpack.c.bf16 %v612_v61, %v612_v61  ;;  %v642_v23 = vrot.slane %v634_v7, 1 }
 0x4c5   :  { %v593_v13 = vpop.permute.xlu0 %592  ;;  %v622_v22 = vpack.c.bf16 %v614_v6, %v614_v6 }
 0x4c6   :  { %v636_v17 = vunpack.c.l.b16 %v620_v8  ;;  %v613_v20 = vmul.f32 %v593_v13, %v3183_v4  ;;  %v599_v21 = vpop.permute.xlu1 %598  ;;  %v643_v0 = vsel %vm308_vm5, %v635_v50, %v642_v23 }
 0x4c7   :  { %v616_v36 = vmul.f32 %v599_v21, %v3196_v48  ;;  %v638_v43 = vunpack.c.l.b16 %v622_v22 }
 0x4c8   :  { %v621_v31 = vpack.c.bf16 %v613_v20, %v613_v20  ;;  %v644_v32 = vrot.slane %v636_v17, 7 }
 0x4c9   :  { %v597_v59 = vpop.permute.xlu0 %596  ;;  %v624_v34 = vpack.c.bf16 %v616_v36, %v616_v36  ;;  %v648_v42 = vrot.slane %v638_v43, 5 }
 0x4ca   :  { %v637_v41 = vunpack.c.l.b16 %v621_v31  ;;  %v615_v57 = vmul.f32 %v597_v59, %v3198_v51  ;;  %v645_v4 = vsel %vm311_vm6, %v644_v32, %v643_v0 }
 0x4cb   :  { %v640_v46 = vunpack.c.l.b16 %v624_v34 }
 0x4cc   :  { %v646_v10 = vrot.slane %v637_v41, 6  ;;  %v623_v35 = vpack.c.bf16 %v615_v57, %v615_v57 }
 0x4cd   :  { %v601_v37 = vpop.permute.xlu0 %600  ;;  %v652_v56 = vrot.slane %v640_v46, 3 }
 0x4ce   :  { %v647_v39 = vsel %vm314_vm7, %v646_v10, %v645_v4  ;;  %v639_v48 = vunpack.c.l.b16 %v623_v35  ;;  %v617_v40 = vmul.f32 %v601_v37, %v3204_v60 }
 0x4cf   :  { %v649_v51 = vsel %vm317_vm8, %v648_v42, %v647_v39 }
 0x4d0   :  { %v650_v47 = vrot.slane %v639_v48, 4  ;;  %v625_v49 = vpack.c.bf16 %v617_v40, %v617_v40 }
 0x4d2   :  { %v651_v45 = vsel %vm320_vm9, %v650_v47, %v649_v51  ;;  %v641_v54 = vunpack.c.l.b16 %v625_v49 }
 0x4d3   :  { %v653_v58 = vsel %vm323_vm10, %v652_v56, %v651_v45 }
 0x4d4   :  { %v654_v55 = vrot.slane %v641_v54, 2 }
 0x4d6   :  { %v655_v53 = vsel %vm326_vm11, %v654_v55, %v653_v58 }
 0x4d7   :  { %v656_v62 = vpack.c.b16 %v655_v53, %v655_v53 }
 0x4d9   :  { %657 = vrot.lane.b32.xlu1 %v656_v62, %s2939_s14 }
 0x54b   :  { %v658_v63 = vpop.permute.xlu1 %657 }
 0x54c   :  { %2609 = vmatmul.mubr.msk.bf16.vlgmr.msra.gmra.mrb[4].mxu1 %vm79_vm0, %v658_v63 }
 0x54d   :  { %2621 = vmatpush3.bf16.msra.mxu1 %v3094_v27  ;;  %2624 = vmatprep.mubr.msk.bf16.mxu1 %vm2938_vm4, %v2937_v24 }
 0x54e   :  { %2622 = vmatprep.subr.bf16.mxu1 %v2937_v24 }
 0x551   :  { %2623 = vmatpush3.bf16.msra.mxu1 %v3103_v28 }
 0x552   :  { %2636 = vmatprep.subr.bf16.mxu1 %v2937_v24 }
 0x61f   :  { %v696_v60 = vpop.f32.mrb[4].mxu1 }
 0x620   :  { %v703_v2 = vrot.slane %v696_v60, 6  ;;  %v704_v61 = vrot.slane %v696_v60, 7  ;;  %v705_v3 = vrot.slane %v696_v60, 1  ;;  %v2610_v6 = vpop.f32.mrb[5].mxu1  ;;  %v707_v7 = vrot.slane %v696_v60, 3 }
 0x621   :  { %v720_v8 = vadd.f32 %v696_v60, %v3002_v12  ;;  %v699_v13 = vpop.f32.mrb[6].mxu1  ;;  %v706_v1 = vrot.slane %v696_v60, 2  ;;  %v709_v31 = vrot.slane %v696_v60, 5  ;;  %v708_v50 = vrot.slane %v696_v60, 4 }
 0x622   :  { %v718_v17 = vadd.f32 %v703_v2, %v3004_v14  ;;  %v719_v20 = vadd.f32 %v704_v61, %v3010_v19  ;;  %v721_v21 = vadd.f32 %v705_v3, %v3006_v16  ;;  %v2611_v22 = vpop.f32.mrb[7].mxu1  ;;  %v723_v32 = vadd.f32 %v707_v7, %v3024_v30 }
 0x623   :  { %v728_v36 = vmul.f32 %v720_v8, %v3000_v11  ;;  %v722_v41 = vadd.f32 %v706_v1, %v3020_v26  ;;  %v725_v43 = vadd.f32 %v709_v31, %v3022_v29  ;;  %v724_v0 = vadd.f32 %v708_v50, %v3018_v25 }
 0x624   :  { %v726_v23 = vmul.f32 %v718_v17, %v3000_v11  ;;  %v727_v59 = vmul.f32 %v719_v20, %v3000_v11  ;;  %v729_v57 = vmul.f32 %v721_v21, %v3000_v11  ;;  %v731_v34 = vmul.f32 %v723_v32, %v3000_v11 }
 0x625   :  { %2740 = vtanh.f32 %v728_v36  ;;  %v730_v10 = vmul.f32 %v722_v41, %v3000_v11  ;;  %v733_v35 = vmul.f32 %v725_v43, %v3000_v11  ;;  %v732_v4 = vmul.f32 %v724_v0, %v3000_v11 }
 0x626   :  { %2742 = vtanh.f32 %v726_v23  ;;  %v768_v0 = vrot.slane %v3220_v52, 7 }
 0x627   :  { %2744 = vtanh.f32 %v727_v59 }
 0x628   :  { %2746 = vtanh.f32 %v729_v57 }
 0x629   :  { %2748 = vtanh.f32 %v731_v34 }
 0x62a   :  { %2750 = vtanh.f32 %v730_v10  ;;  %v766_v10 = vrot.slane %v3214_v5, 7 }
 0x62b   :  { %2752 = vtanh.f32 %v733_v35 }
 0x62c   :  { %2754 = vtanh.f32 %v732_v4 }
 0x62f   :  { %v2741_v37 = vpop.eup %2740 }
 0x630   :  { %v2743_v39 = vpop.eup %2742  ;;  %802 = vrot.lane.b32.xlu1 %v2741_v37, %s2935_s0  ;;  %v744_v51 = vmul.f32 0.5, %v2741_v37 }
 0x631   :  { %798 = vrot.lane.b32.xlu0 %v2743_v39, %s2935_s0  ;;  %v2745_v48 = vpop.eup %2744  ;;  %v742_v45 = vmul.f32 0.5, %v2743_v39  ;;  %v767_v39 = vrot.slane %v3210_v18, 7 }
 0x632   :  { %v2747_v40 = vpop.eup %2746  ;;  %v3296_v54 = vadd.f32 0.5, %v744_v51  ;;  %v743_v56 = vmul.f32 0.5, %v2745_v48 }
 0x633   :  { %v2749_v42 = vpop.eup %2748  ;;  %v3298_v58 = vadd.f32 0.5, %v742_v45  ;;  %v745_v53 = vmul.f32 0.5, %v2747_v40  ;;  %v770_v45 = vrot.slane %v3222_v33, 7 }
 0x634   :  { %800 = vrot.lane.b32.xlu1 %v2745_v48, %s2935_s0  ;;  %v2751_v46 = vpop.eup %2750  ;;  %v3303_v2 = vadd.f32 0.5, %v743_v56  ;;  %v747_v61 = vmul.f32 0.5, %v2749_v42  ;;  %v784_v35 = vmul.f32 %v768_v0, %v3296_v54 }
 0x635   :  { %804 = vrot.lane.b32.xlu0 %v2747_v40, %s2935_s0  ;;  %v2753_v47 = vpop.eup %2752  ;;  %v3306_v6 = vadd.f32 0.5, %v745_v53  ;;  %v746_v7 = vmul.f32 0.5, %v2751_v46  ;;  %v782_v37 = vmul.f32 %v766_v10, %v3298_v58 }
 0x636   :  { %v2755_v49 = vpop.eup %2754  ;;  %v3311_v17 = vadd.f32 0.5, %v747_v61  ;;  %v749_v20 = vmul.f32 0.5, %v2753_v47  ;;  %v783_v52 = vmul.f32 %v767_v39, %v3303_v2 }
 0x637   :  { %v3314_v22 = vadd.f32 0.5, %v746_v7  ;;  %v748_v36 = vmul.f32 0.5, %v2755_v49 }
 0x638   :  { %808 = vrot.lane.b32.xlu1 %v2749_v42, %s2935_s0  ;;  %v3319_v59 = vadd.f32 0.5, %v749_v20  ;;  %v769_v42 = vrot.slane %v3225_v9, 7 }
 0x639   :  { %806 = vrot.lane.b32.xlu0 %v2751_v46, %s2935_s0  ;;  %v3322_v41 = vadd.f32 0.5, %v748_v36  ;;  %v786_v53 = vmul.f32 %v770_v45, %v3314_v22 }
 0x63c   :  { %812 = vrot.lane.b32.xlu1 %v2753_v47, %s2935_s0  ;;  %v785_v47 = vmul.f32 %v769_v42, %v3306_v6 }
 0x63d   :  { %810 = vrot.lane.b32.xlu0 %v2755_v49, %s2935_s0  ;;  %v771_v49 = vrot.slane %v3234_v38, 7 }
 0x63f   :  { %v787_v9 = vmul.f32 %v771_v49, %v3311_v17 }
 0x6a2   :  { %v803_v55 = vpop.permute.xlu1 %802 }
 0x6a3   :  { %v824_v62 = vmul.f32 %v803_v55, %v3296_v54  ;;  %v799_v63 = vpop.permute.xlu0 %798 }
 0x6a4   :  { %v822_v60 = vmul.f32 %v799_v63, %v3298_v58 }
 0x6a5   :  { %842 = vrot.lane.b32.xlu1 %v824_v62, %s2939_s14  ;;  %v773_v62 = vrot.slane %v3240_v44, 7 }
 0x6a6   :  { %v801_v3 = vpop.permute.xlu1 %800  ;;  %838 = vrot.lane.b32.xlu0 %v822_v60, %s2939_s14  ;;  %v772_v60 = vrot.slane %v3230_v15, 7 }
 0x6a7   :  { %v823_v8 = vmul.f32 %v801_v3, %v3303_v2  ;;  %v805_v13 = vpop.permute.xlu0 %804  ;;  %v789_v33 = vmul.f32 %v773_v62, %v3319_v59 }
 0x6a8   :  { %v825_v1 = vmul.f32 %v805_v13, %v3306_v6  ;;  %v788_v7 = vmul.f32 %v772_v60, %v3322_v41 }
 0x6a9   :  { %840 = vrot.lane.b32.xlu1 %v823_v8, %s2939_s14 }
 0x6aa   :  { %v809_v21 = vpop.permute.xlu1 %808  ;;  %844 = vrot.lane.b32.xlu0 %v825_v1, %s2939_s14 }
 0x6ab   :  { %v827_v23 = vmul.f32 %v809_v21, %v3311_v17  ;;  %v807_v31 = vpop.permute.xlu0 %806 }
 0x6ac   :  { %v826_v32 = vmul.f32 %v807_v31, %v3314_v22 }
 0x6ad   :  { %848 = vrot.lane.b32.xlu1 %v827_v23, %s2939_s14 }
 0x6ae   :  { %v813_v50 = vpop.permute.xlu1 %812  ;;  %846 = vrot.lane.b32.xlu0 %v826_v32, %s2939_s14 }
 0x6af   :  { %v829_v57 = vmul.f32 %v813_v50, %v3319_v59  ;;  %v811_v43 = vpop.permute.xlu0 %810 }
 0x6b0   :  { %v828_v34 = vmul.f32 %v811_v43, %v3322_v41 }
 0x6b1   :  { %852 = vrot.lane.b32.xlu1 %v829_v57, %s2939_s14 }
 0x6b2   :  { %850 = vrot.lane.b32.xlu0 %v828_v34, %s2939_s14 }
 0x717   :  { %v843_v4 = vpop.permute.xlu1 %842 }
 0x718   :  { %v3333_v48 = vadd.f32 %v843_v4, %v784_v35  ;;  %v839_v40 = vpop.permute.xlu0 %838 }
 0x719   :  { %v3336_v46 = vadd.f32 %v839_v40, %v782_v37 }
 0x71a   :  { %2756 = vtanh.f32 %v3333_v48 }
 0x71b   :  { %2758 = vtanh.f32 %v3336_v46  ;;  %v841_v5 = vpop.permute.xlu1 %840 }
 0x71c   :  { %v3343_v51 = vadd.f32 %v841_v5, %v783_v52  ;;  %v845_v18 = vpop.permute.xlu0 %844 }
 0x71d   :  { %v3346_v56 = vadd.f32 %v845_v18, %v785_v47 }
 0x71e   :  { %2760 = vtanh.f32 %v3343_v51 }
 0x71f   :  { %2762 = vtanh.f32 %v3346_v56  ;;  %v849_v55 = vpop.permute.xlu1 %848 }
 0x720   :  { %v3353_v63 = vadd.f32 %v849_v55, %v787_v9  ;;  %v847_v38 = vpop.permute.xlu0 %846 }
 0x721   :  { %v3356_v61 = vadd.f32 %v847_v38, %v786_v53 }
 0x722   :  { %2764 = vtanh.f32 %v3353_v63 }
 0x723   :  { %2766 = vtanh.f32 %v3356_v61  ;;  %v853_v3 = vpop.permute.xlu1 %852 }
 0x724   :  { %v2757_v8 = vpop.eup %2756  ;;  %v3362_v13 = vadd.f32 %v853_v3, %v789_v33  ;;  %v851_v44 = vpop.permute.xlu0 %850 }
 0x725   :  { %v2759_v1 = vpop.eup %2758  ;;  %890 = vrot.lane.b32.xlu1 %v2757_v8, %s2935_s0  ;;  %v3365_v20 = vadd.f32 %v851_v44, %v788_v7 }
 0x726   :  { %2768 = vtanh.f32 %v3362_v13  ;;  %886 = vrot.lane.b32.xlu0 %v2759_v1, %s2935_s0 }
 0x727   :  { %2770 = vtanh.f32 %v3365_v20 }
 0x728   :  { %v2761_v15 = vpop.eup %2760 }
 0x729   :  { %v2763_v21 = vpop.eup %2762  ;;  %888 = vrot.lane.b32.xlu1 %v2761_v15, %s2935_s0 }
 0x72a   :  { %892 = vrot.lane.b32.xlu0 %v2763_v21, %s2935_s0 }
 0x72c   :  { %v2765_v36 = vpop.eup %2764 }
 0x72d   :  { %v2767_v23 = vpop.eup %2766  ;;  %896 = vrot.lane.b32.xlu1 %v2765_v36, %s2935_s0 }
 0x72e   :  { %894 = vrot.lane.b32.xlu0 %v2767_v23, %s2935_s0 }
 0x730   :  { %v2769_v31 = vpop.eup %2768 }
 0x731   :  { %v2771_v32 = vpop.eup %2770  ;;  %900 = vrot.lane.b32.xlu1 %v2769_v31, %s2935_s0 }
 0x732   :  { %898 = vrot.lane.b32.xlu0 %v2771_v32, %s2935_s0 }
 0x797   :  { %v891_v50 = vpop.permute.xlu1 %890 }
 0x798   :  { %v887_v57 = vpop.permute.xlu0 %886  ;;  %v912_v34 = vmul.f32 %v891_v50, %v3296_v54 }
 0x799   :  { %v910_v43 = vmul.f32 %v887_v57, %v3298_v58 }
 0x79a   :  { %v920_v42 = vpack.c.bf16 %v912_v34, %v912_v34 }
 0x79b   :  { %v918_v0 = vpack.c.bf16 %v910_v43, %v910_v43  ;;  %v889_v10 = vpop.permute.xlu1 %888 }
 0x79c   :  { %v911_v35 = vmul.f32 %v889_v10, %v3303_v2  ;;  %v893_v4 = vpop.permute.xlu0 %892  ;;  %v936_v53 = vunpack.c.l.b16 %v920_v42 }
 0x79d   :  { %v913_v37 = vmul.f32 %v893_v4, %v3306_v6  ;;  %v934_v39 = vunpack.c.l.b16 %v918_v0 }
 0x79e   :  { %v919_v40 = vpack.c.bf16 %v911_v35, %v911_v35 }
 0x79f   :  { %v921_v52 = vpack.c.bf16 %v913_v37, %v913_v37  ;;  %v897_v5 = vpop.permute.xlu1 %896  ;;  %v942_v54 = vrot.slane %v934_v39, 2 }
 0x7a0   :  { %v935_v47 = vunpack.c.l.b16 %v919_v40  ;;  %v915_v49 = vmul.f32 %v897_v5, %v3311_v17  ;;  %v895_v18 = vpop.permute.xlu0 %894 }
 0x7a1   :  { %v937_v45 = vunpack.c.l.b16 %v921_v52  ;;  %v914_v58 = vmul.f32 %v895_v18, %v3314_v22 }
 0x7a2   :  { %v943_v9 = vrot.slane %v935_v47, 1  ;;  %v923_v55 = vpack.c.bf16 %v915_v49, %v915_v49 }
 0x7a3   :  { %v922_v2 = vpack.c.bf16 %v914_v58, %v914_v58  ;;  %v901_v62 = vpop.permute.xlu1 %900  ;;  %v946_v38 = vrot.slane %v937_v45, 7 }
 0x7a4   :  { %v944_v6 = vsel %vm308_vm5, %v943_v9, %v942_v54  ;;  %v917_v60 = vmul.f32 %v901_v62, %v3319_v59  ;;  %v899_v33 = vpop.permute.xlu0 %898  ;;  %v939_v8 = vunpack.c.l.b16 %v923_v55 }
 0x7a5   :  { %v945_v3 = vsel %vm311_vm6, %v936_v53, %v944_v6  ;;  %v938_v7 = vunpack.c.l.b16 %v922_v2  ;;  %v916_v17 = vmul.f32 %v899_v33, %v3322_v41 }
 0x7a6   :  { %v925_v44 = vpack.c.bf16 %v917_v60, %v917_v60  ;;  %v947_v15 = vsel %vm314_vm7, %v946_v38, %v945_v3  ;;  %v950_v31 = vrot.slane %v939_v8, 5 }
 0x7a7   :  { %v948_v22 = vrot.slane %v938_v7, 6  ;;  %v924_v1 = vpack.c.bf16 %v916_v17, %v916_v17 }
 0x7a8   :  { %v941_v21 = vunpack.c.l.b16 %v925_v44 }
 0x7a9   :  { %v949_v36 = vsel %vm317_vm8, %v948_v22, %v947_v15  ;;  %v940_v23 = vunpack.c.l.b16 %v924_v1 }
 0x7aa   :  { %v954_v50 = vrot.slane %v941_v21, 3  ;;  %v951_v59 = vsel %vm320_vm9, %v950_v31, %v949_v36 }
 0x7ab   :  { %v952_v32 = vrot.slane %v940_v23, 4 }
 0x7ad   :  { %v953_v57 = vsel %vm323_vm10, %v952_v32, %v951_v59 }
 0x7ae   :  { %v955_v43 = vsel %vm326_vm11, %v954_v50, %v953_v57 }
 0x7af   :  { %v956_v41 = vpack.c.b16 %v955_v43, %v955_v43 }
 0x7b1   :  { %957 = vrot.lane.b32.xlu0 %v956_v41, %s2939_s14 }
 0x823   :  { %v958_v34 = vpop.permute.xlu0 %957 }
 0x824   :  { %2617 = vmatmul.mubr.msk.bf16.vlgmr.msra.gmra.mrb[8].mxu0 %vm79_vm0, %v958_v34 }
 0x825   :  { %2629 = vmatpush3.bf16.msra.mxu0 %v3094_v27  ;;  %2632 = vmatprep.mubr.msk.bf16.mxu0 %vm2938_vm4, %v2937_v24 }
 0x826   :  { %2630 = vmatprep.subr.bf16.mxu0 %v2937_v24 }
 0x829   :  { %2631 = vmatpush3.bf16.msra.mxu0 %v3103_v28 }
 0x82a   :  { %2644 = vmatprep.subr.bf16.mxu0 %v2937_v24 }
 0x8f7   :  { %v996_v0 = vpop.f32.mrb[8].mxu0 }
 0x8f8   :  { %v1003_v10 = vrot.slane %v996_v0, 5  ;;  %v1004_v35 = vrot.slane %v996_v0, 6  ;;  %v1006_v4 = vrot.slane %v996_v0, 1  ;;  %v2618_v37 = vpop.f32.mrb[9].mxu0  ;;  %v1005_v39 = vrot.slane %v996_v0, 7 }
 0x8f9   :  { %v1021_v40 = vadd.f32 %v996_v0, %v3006_v16  ;;  %v999_v42 = vpop.f32.mrb[10].mxu0  ;;  %v1007_v52 = vrot.slane %v996_v0, 2  ;;  %v1008_v45 = vrot.slane %v996_v0, 3  ;;  %v1009_v9 = vrot.slane %v996_v0, 4 }
 0x8fa   :  { %v1018_v27 = vadd.f32 %v1003_v10, %v3004_v14  ;;  %v1019_v5 = vadd.f32 %v1004_v35, %v3010_v19  ;;  %v1022_v47 = vadd.f32 %v1006_v4, %v3020_v26  ;;  %v2619_v49 = vpop.f32.mrb[11].mxu0  ;;  %v1020_v58 = vadd.f32 %v1005_v39, %v3002_v12 }
 0x8fb   :  { %v1029_v28 = vmul.f32 %v1021_v40, %v3000_v11  ;;  %v1023_v55 = vadd.f32 %v1007_v52, %v3024_v30  ;;  %v1024_v2 = vadd.f32 %v1008_v45, %v3018_v25  ;;  %v1025_v6 = vadd.f32 %v1009_v9, %v3022_v29 }
 0x8fc   :  { %v1027_v18 = vmul.f32 %v1019_v5, %v3000_v11  ;;  %v1026_v54 = vmul.f32 %v1018_v27, %v3000_v11  ;;  %v1030_v53 = vmul.f32 %v1022_v47, %v3000_v11  ;;  %v1028_v62 = vmul.f32 %v1020_v58, %v3000_v11 }
 0x8fd   :  { %2772 = vtanh.f32 %v1029_v28  ;;  %v1031_v38 = vmul.f32 %v1023_v55, %v3000_v11  ;;  %v1032_v60 = vmul.f32 %v1024_v2, %v3000_v11  ;;  %v1033_v33 = vmul.f32 %v1025_v6, %v3000_v11 }
 0x8fe   :  { %2774 = vtanh.f32 %v1027_v18  ;;  %v1069_v2 = vrot.slane %v3346_v56, 7 }
 0x8ff   :  { %2776 = vtanh.f32 %v1026_v54 }
 0x900   :  { %2778 = vtanh.f32 %v1030_v53 }
 0x901   :  { %2780 = vtanh.f32 %v1028_v62  ;;  %v1067_v62 = vrot.slane %v3343_v51, 7 }
 0x902   :  { %2782 = vtanh.f32 %v1031_v38 }
 0x903   :  { %2784 = vtanh.f32 %v1032_v60 }
 0x904   :  { %2786 = vtanh.f32 %v1033_v33  ;;  %v1066_v33 = vrot.slane %v3336_v46, 7 }
 0x907   :  { %v2773_v3 = vpop.eup %2772 }
 0x908   :  { %v2775_v7 = vpop.eup %2774  ;;  %1104 = vrot.lane.b32.xlu1 %v2773_v3, %s2935_s0  ;;  %v1045_v21 = vmul.f32 0.5, %v2773_v3 }
 0x909   :  { %1100 = vrot.lane.b32.xlu0 %v2775_v7, %s2935_s0  ;;  %v2777_v17 = vpop.eup %2776  ;;  %v1043_v36 = vmul.f32 0.5, %v2775_v7 }
 0x90a   :  { %v2779_v8 = vpop.eup %2778  ;;  %v3423_v23 = vadd.f32 0.5, %v1045_v21  ;;  %v1042_v31 = vmul.f32 0.5, %v2777_v17 }
 0x90b   :  { %v2781_v44 = vpop.eup %2780  ;;  %v3425_v50 = vadd.f32 0.5, %v1043_v36  ;;  %v1046_v59 = vmul.f32 0.5, %v2779_v8 }
 0x90c   :  { %1098 = vrot.lane.b32.xlu1 %v2777_v17, %s2935_s0  ;;  %v2783_v22 = vpop.eup %2782  ;;  %v3430_v34 = vadd.f32 0.5, %v1042_v31  ;;  %v1044_v0 = vmul.f32 0.5, %v2781_v44  ;;  %v1085_v6 = vmul.f32 %v1069_v2, %v3423_v23  ;;  %v1070_v17 = vrot.slane %v3356_v61, 7 }
 0x90d   :  { %1106 = vrot.lane.b32.xlu0 %v2779_v8, %s2935_s0  ;;  %v2785_v1 = vpop.eup %2784  ;;  %v3433_v35 = vadd.f32 0.5, %v1046_v59  ;;  %v1047_v4 = vmul.f32 0.5, %v2783_v22  ;;  %v1083_v60 = vmul.f32 %v1067_v62, %v3425_v50 }
 0x90e   :  { %v2787_v15 = vpop.eup %2786  ;;  %v3438_v42 = vadd.f32 0.5, %v1044_v0  ;;  %v1048_v52 = vmul.f32 0.5, %v2785_v1  ;;  %v1082_v56 = vmul.f32 %v1066_v33, %v3430_v34 }
 0x90f   :  { %v3441_v5 = vadd.f32 0.5, %v1047_v4  ;;  %v1049_v47 = vmul.f32 0.5, %v2787_v15 }
 0x910   :  { %1102 = vrot.lane.b32.xlu1 %v2781_v44, %s2935_s0  ;;  %v3446_v45 = vadd.f32 0.5, %v1048_v52  ;;  %v1086_v44 = vmul.f32 %v1070_v17, %v3433_v35 }
 0x911   :  { %1108 = vrot.lane.b32.xlu0 %v2783_v22, %s2935_s0  ;;  %v3449_v54 = vadd.f32 0.5, %v1049_v47  ;;  %v1068_v22 = vrot.slane %v3333_v48, 7 }
 0x913   :  { %v1084_v61 = vmul.f32 %v1068_v22, %v3438_v42 }
 0x914   :  { %1110 = vrot.lane.b32.xlu1 %v2785_v1, %s2935_s0 }
 0x915   :  { %1112 = vrot.lane.b32.xlu0 %v2787_v15, %s2935_s0  ;;  %v1071_v15 = vrot.slane %v3353_v63, 7 }
 0x917   :  { %v1087_v31 = vmul.f32 %v1071_v15, %v3441_v5 }
 0x97a   :  { %v1105_v32 = vpop.permute.xlu1 %1104 }
 0x97b   :  { %v1125_v57 = vmul.f32 %v1105_v32, %v3423_v23  ;;  %v1101_v43 = vpop.permute.xlu0 %1100  ;;  %v1072_v32 = vrot.slane %v3365_v20, 7 }
 0x97c   :  { %v1123_v41 = vmul.f32 %v1101_v43, %v3425_v50 }
 0x97d   :  { %1144 = vrot.lane.b32.xlu1 %v1125_v57, %s2939_s14  ;;  %v1073_v57 = vrot.slane %v3362_v13, 7  ;;  %v1088_v63 = vmul.f32 %v1072_v32, %v3446_v45 }
 0x97e   :  { %v1099_v10 = vpop.permute.xlu1 %1098  ;;  %1140 = vrot.lane.b32.xlu0 %v1123_v41, %s2939_s14 }
 0x97f   :  { %v1122_v37 = vmul.f32 %v1099_v10, %v3430_v34  ;;  %v1107_v39 = vpop.permute.xlu0 %1106  ;;  %v1089_v0 = vmul.f32 %v1073_v57, %v3449_v54 }
 0x980   :  { %v1126_v40 = vmul.f32 %v1107_v39, %v3433_v35 }
 0x981   :  { %1138 = vrot.lane.b32.xlu1 %v1122_v37, %s2939_s14 }
 0x982   :  { %v1103_v27 = vpop.permute.xlu1 %1102  ;;  %1146 = vrot.lane.b32.xlu0 %v1126_v40, %s2939_s14 }
 0x983   :  { %v1124_v49 = vmul.f32 %v1103_v27, %v3438_v42  ;;  %v1109_v28 = vpop.permute.xlu0 %1108 }
 0x984   :  { %v1127_v18 = vmul.f32 %v1109_v28, %v3441_v5 }
 0x985   :  { %1142 = vrot.lane.b32.xlu1 %v1124_v49, %s2939_s14 }
 0x986   :  { %v1111_v58 = vpop.permute.xlu1 %1110  ;;  %1148 = vrot.lane.b32.xlu0 %v1127_v18, %s2939_s14 }
 0x987   :  { %v1128_v9 = vmul.f32 %v1111_v58, %v3446_v45  ;;  %v1113_v55 = vpop.permute.xlu0 %1112 }
 0x988   :  { %v1129_v53 = vmul.f32 %v1113_v55, %v3449_v54 }
 0x989   :  { %1150 = vrot.lane.b32.xlu1 %v1128_v9, %s2939_s14 }
 0x98a   :  { %1152 = vrot.lane.b32.xlu0 %v1129_v53, %s2939_s14 }
 0x9ef   :  { %v1145_v38 = vpop.permute.xlu1 %1144 }
 0x9f0   :  { %v3460_v3 = vadd.f32 %v1145_v38, %v1085_v6  ;;  %v1141_v7 = vpop.permute.xlu0 %1140 }
 0x9f1   :  { %v3463_v8 = vadd.f32 %v1141_v7, %v1083_v60 }
 0x9f2   :  { %2788 = vtanh.f32 %v3460_v3 }
 0x9f3   :  { %2790 = vtanh.f32 %v3463_v8  ;;  %v1139_v51 = vpop.permute.xlu1 %1138 }
 0x9f4   :  { %v3470_v1 = vadd.f32 %v1139_v51, %v1082_v56  ;;  %v1147_v46 = vpop.permute.xlu0 %1146 }
 0x9f5   :  { %v3473_v21 = vadd.f32 %v1147_v46, %v1086_v44 }
 0x9f6   :  { %2792 = vtanh.f32 %v3470_v1 }
 0x9f7   :  { %2794 = vtanh.f32 %v3473_v21  ;;  %v1143_v36 = vpop.permute.xlu1 %1142 }
 0x9f8   :  { %v3480_v59 = vadd.f32 %v1143_v36, %v1084_v61  ;;  %v1149_v48 = vpop.permute.xlu0 %1148 }
 0x9f9   :  { %v3483_v43 = vadd.f32 %v1149_v48, %v1087_v31 }
 0x9fa   :  { %2796 = vtanh.f32 %v3480_v59 }
 0x9fb   :  { %2798 = vtanh.f32 %v3483_v43  ;;  %v1151_v41 = vpop.permute.xlu1 %1150 }
 0x9fc   :  { %v2789_v10 = vpop.eup %2788  ;;  %v3489_v4 = vadd.f32 %v1151_v41, %v1088_v63  ;;  %v1153_v20 = vpop.permute.xlu0 %1152 }
 0x9fd   :  { %v2791_v37 = vpop.eup %2790  ;;  %v3491_v39 = vadd.f32 %v1153_v20, %v1089_v0  ;;  %1192 = vrot.lane.b32.xlu1 %v2789_v10, %s2935_s0 }
 0x9fe   :  { %2800 = vtanh.f32 %v3489_v4  ;;  %1188 = vrot.lane.b32.xlu0 %v2791_v37, %s2935_s0 }
 0x9ff   :  { %2802 = vtanh.f32 %v3491_v39 }
 0xa00   :  { %v2793_v13 = vpop.eup %2792 }
 0xa01   :  { %v2795_v40 = vpop.eup %2794  ;;  %1186 = vrot.lane.b32.xlu1 %v2793_v13, %s2935_s0 }
 0xa02   :  { %1194 = vrot.lane.b32.xlu0 %v2795_v40, %s2935_s0 }
 0xa04   :  { %v2797_v52 = vpop.eup %2796 }
 0xa05   :  { %v2799_v27 = vpop.eup %2798  ;;  %1190 = vrot.lane.b32.xlu1 %v2797_v52, %s2935_s0 }
 0xa06   :  { %1196 = vrot.lane.b32.xlu0 %v2799_v27, %s2935_s0 }
 0xa08   :  { %v2801_v47 = vpop.eup %2800 }
 0xa09   :  { %v2803_v49 = vpop.eup %2802  ;;  %1198 = vrot.lane.b32.xlu1 %v2801_v47, %s2935_s0 }
 0xa0a   :  { %1200 = vrot.lane.b32.xlu0 %v2803_v49, %s2935_s0 }
 0xa6f   :  { %v1193_v28 = vpop.permute.xlu1 %1192 }
 0xa70   :  { %v1189_v18 = vpop.permute.xlu0 %1188  ;;  %v1213_v38 = vmul.f32 %v1193_v28, %v3423_v23 }
 0xa71   :  { %v1211_v58 = vmul.f32 %v1189_v18, %v3425_v50 }
 0xa72   :  { %v1221_v22 = vpack.c.bf16 %v1213_v38, %v1213_v38 }
 0xa73   :  { %v1187_v9 = vpop.permute.xlu1 %1186  ;;  %v1219_v2 = vpack.c.bf16 %v1211_v58, %v1211_v58  ;;  %v3523_v58 = vld [vmem:[%s4020_s2] sm:$0xff]  }
 0xa74   :  { %v1210_v55 = vmul.f32 %v1187_v9, %v3430_v34  ;;  %v1195_v53 = vpop.permute.xlu0 %1194  ;;  %v1237_v63 = vunpack.c.l.b16 %v1221_v22  ;;  %v3532_v9 = vld [vmem:[%s4020_s2 + $0x8] sm:$0xff]  }
 0xa75   :  { %v1214_v62 = vmul.f32 %v1195_v53, %v3433_v35  ;;  %v1235_v51 = vunpack.c.l.b16 %v1219_v2 }
 0xa76   :  { %v1218_v6 = vpack.c.bf16 %v1210_v55, %v1210_v55 }
 0xa77   :  { %v1191_v60 = vpop.permute.xlu1 %1190  ;;  %v1222_v7 = vpack.c.bf16 %v1214_v62, %v1214_v62  ;;  %v1243_v23 = vrot.slane %v1235_v51, 2 }
 0xa78   :  { %v1234_v33 = vunpack.c.l.b16 %v1218_v6  ;;  %v1212_v17 = vmul.f32 %v1191_v60, %v3438_v42  ;;  %v1197_v56 = vpop.permute.xlu0 %1196 }
 0xa79   :  { %v1215_v44 = vmul.f32 %v1197_v56, %v3441_v5  ;;  %v1238_v61 = vunpack.c.l.b16 %v1222_v7 }
 0xa7a   :  { %v1220_v50 = vpack.c.bf16 %v1212_v17, %v1212_v17  ;;  %v1242_v46 = vrot.slane %v1234_v33, 3 }
 0xa7b   :  { %v1223_v34 = vpack.c.bf16 %v1215_v44, %v1215_v44  ;;  %v1199_v15 = vpop.permute.xlu1 %1198  ;;  %v1248_v10 = vrot.slane %v1238_v61, 7 }
 0xa7c   :  { %v1236_v36 = vunpack.c.l.b16 %v1220_v50  ;;  %v1216_v35 = vmul.f32 %v1199_v15, %v3446_v45  ;;  %v1201_v31 = vpop.permute.xlu0 %1200  ;;  %v1244_v41 = vsel %vm308_vm5, %v1243_v23, %v1242_v46 }
 0xa7d   :  { %v1239_v32 = vunpack.c.l.b16 %v1223_v34  ;;  %v1217_v48 = vmul.f32 %v1201_v31, %v3449_v54 }
 0xa7e   :  { %v1245_v57 = vrot.slane %v1236_v36, 1  ;;  %v1224_v42 = vpack.c.bf16 %v1216_v35, %v1216_v35 }
 0xa7f   :  { %v1250_v5 = vrot.slane %v1239_v32, 6  ;;  %v1225_v0 = vpack.c.bf16 %v1217_v48, %v1217_v48 }
 0xa80   :  { %v1246_v20 = vsel %vm311_vm6, %v1245_v57, %v1244_v41  ;;  %v1240_v37 = vunpack.c.l.b16 %v1224_v42 }
 0xa81   :  { %v1247_v13 = vsel %vm314_vm7, %v1237_v63, %v1246_v20  ;;  %v1241_v40 = vunpack.c.l.b16 %v1225_v0 }
 0xa82   :  { %v1249_v45 = vsel %vm317_vm8, %v1248_v10, %v1247_v13  ;;  %v1252_v52 = vrot.slane %v1240_v37, 5 }
 0xa83   :  { %v1251_v27 = vsel %vm320_vm9, %v1250_v5, %v1249_v45  ;;  %v1254_v54 = vrot.slane %v1241_v40, 4 }
 0xa84   :  { %v1253_v47 = vsel %vm323_vm10, %v1252_v52, %v1251_v27 }
 0xa85   :  { %v1255_v49 = vsel %vm326_vm11, %v1254_v54, %v1253_v47 }
 0xa86   :  { %v1256_v28 = vpack.c.b16 %v1255_v49, %v1255_v49 }
 0xa88   :  { %1257 = vrot.lane.b32.xlu1 %v1256_v28, %s2939_s14 }
 0xafa   :  { %v1258_v18 = vpop.permute.xlu1 %1257 }
 0xafb   :  { %2625 = vmatmul.mubr.msk.bf16.vlgmr.msra.gmra.mrb[8].mxu1 %vm79_vm0, %v1258_v18 }
 0xafc   :  { %2637 = vmatpush3.bf16.msra.mxu1 %v3523_v58  ;;  %2640 = vmatprep.mubr.msk.bf16.mxu1 %vm2938_vm4, %v2937_v24 }
 0xafd   :  { %2638 = vmatprep.subr.bf16.mxu1 %v2937_v24 }
 0xb00   :  { %2639 = vmatpush3.bf16.msra.mxu1 %v3532_v9 }
 0xb01   :  { %2652 = vmatprep.subr.bf16.mxu1 %v2937_v24 }
 0xbce   :  { %v1296_v55 = vpop.f32.mrb[8].mxu1 }
 0xbcf   :  { %v1303_v53 = vrot.slane %v1296_v55, 4  ;;  %v1304_v2 = vrot.slane %v1296_v55, 5  ;;  %v1305_v62 = vrot.slane %v1296_v55, 6  ;;  %v2626_v6 = vpop.f32.mrb[9].mxu1  ;;  %v1306_v38 = vrot.slane %v1296_v55, 7 }
 0xbd0   :  { %v1322_v60 = vadd.f32 %v1296_v55, %v3020_v26  ;;  %v1299_v33 = vpop.f32.mrb[10].mxu1  ;;  %v1307_v7 = vrot.slane %v1296_v55, 1  ;;  %v1309_v46 = vrot.slane %v1296_v55, 3  ;;  %v1308_v61 = vrot.slane %v1296_v55, 2 }
 0xbd1   :  { %v1318_v17 = vadd.f32 %v1303_v53, %v3004_v14  ;;  %v1319_v56 = vadd.f32 %v1304_v2, %v3010_v19  ;;  %v1320_v51 = vadd.f32 %v1305_v62, %v3002_v12  ;;  %v2627_v44 = vpop.f32.mrb[11].mxu1  ;;  %v1321_v34 = vadd.f32 %v1306_v38, %v3006_v16 }
 0xbd2   :  { %v1330_v50 = vmul.f32 %v1322_v60, %v3000_v11  ;;  %v1323_v36 = vadd.f32 %v1307_v7, %v3024_v30  ;;  %v1325_v31 = vadd.f32 %v1309_v46, %v3022_v29  ;;  %v1324_v32 = vadd.f32 %v1308_v61, %v3018_v25 }
 0xbd3   :  { %v1326_v22 = vmul.f32 %v1318_v17, %v3000_v11  ;;  %v1327_v15 = vmul.f32 %v1319_v56, %v3000_v11  ;;  %v1328_v35 = vmul.f32 %v1320_v51, %v3000_v11  ;;  %v1329_v23 = vmul.f32 %v1321_v34, %v3000_v11 }
 0xbd4   :  { %2804 = vtanh.f32 %v1330_v50  ;;  %v1331_v48 = vmul.f32 %v1323_v36, %v3000_v11  ;;  %v1333_v57 = vmul.f32 %v1325_v31, %v3000_v11  ;;  %v1332_v42 = vmul.f32 %v1324_v32, %v3000_v11 }
 0xbd5   :  { %2806 = vtanh.f32 %v1326_v22  ;;  %v1370_v32 = vrot.slane %v3473_v21, 7 }
 0xbd6   :  { %2808 = vtanh.f32 %v1327_v15 }
 0xbd7   :  { %2810 = vtanh.f32 %v1328_v35 }
 0xbd8   :  { %2812 = vtanh.f32 %v1329_v23 }
 0xbd9   :  { %2814 = vtanh.f32 %v1331_v48  ;;  %v1366_v48 = vrot.slane %v3470_v1, 7 }
 0xbda   :  { %2816 = vtanh.f32 %v1333_v57 }
 0xbdb   :  { %2818 = vtanh.f32 %v1332_v42 }
 0xbde   :  { %v2805_v63 = vpop.eup %2804 }
 0xbdf   :  { %v2807_v41 = vpop.eup %2806  ;;  %1406 = vrot.lane.b32.xlu1 %v2805_v63, %s2935_s0  ;;  %v1346_v40 = vmul.f32 0.5, %v2805_v63 }
 0xbe0   :  { %1398 = vrot.lane.b32.xlu0 %v2807_v41, %s2935_s0  ;;  %v2809_v5 = vpop.eup %2808  ;;  %v1342_v45 = vmul.f32 0.5, %v2807_v41  ;;  %v1367_v41 = vrot.slane %v3463_v8, 7 }
 0xbe1   :  { %v2811_v0 = vpop.eup %2810  ;;  %v3560_v52 = vadd.f32 0.5, %v1346_v40  ;;  %v1343_v27 = vmul.f32 0.5, %v2809_v5 }
 0xbe2   :  { %v2813_v10 = vpop.eup %2812  ;;  %v3562_v47 = vadd.f32 0.5, %v1342_v45  ;;  %v1344_v49 = vmul.f32 0.5, %v2811_v0  ;;  %v1371_v45 = vrot.slane %v3483_v43, 7 }
 0xbe3   :  { %1400 = vrot.lane.b32.xlu1 %v2809_v5, %s2935_s0  ;;  %v2815_v20 = vpop.eup %2814  ;;  %v3567_v53 = vadd.f32 0.5, %v1343_v27  ;;  %v1345_v2 = vmul.f32 0.5, %v2813_v10  ;;  %v1386_v57 = vmul.f32 %v1370_v32, %v3560_v52 }
 0xbe4   :  { %1402 = vrot.lane.b32.xlu0 %v2811_v0, %s2935_s0  ;;  %v2817_v37 = vpop.eup %2816  ;;  %v3570_v6 = vadd.f32 0.5, %v1344_v49  ;;  %v1347_v38 = vmul.f32 0.5, %v2815_v20  ;;  %v1382_v63 = vmul.f32 %v1366_v48, %v3562_v47 }
 0xbe5   :  { %v2819_v13 = vpop.eup %2818  ;;  %v3575_v17 = vadd.f32 0.5, %v1345_v2  ;;  %v1349_v56 = vmul.f32 0.5, %v2817_v37  ;;  %v1383_v21 = vmul.f32 %v1367_v41, %v3567_v53 }
 0xbe6   :  { %v3578_v44 = vadd.f32 0.5, %v1347_v38  ;;  %v1348_v50 = vmul.f32 0.5, %v2819_v13 }
 0xbe7   :  { %1404 = vrot.lane.b32.xlu1 %v2813_v10, %s2935_s0  ;;  %v3583_v15 = vadd.f32 0.5, %v1349_v56  ;;  %v1368_v10 = vrot.slane %v3480_v59, 7 }
 0xbe8   :  { %1408 = vrot.lane.b32.xlu0 %v2815_v20, %s2935_s0  ;;  %v3586_v36 = vadd.f32 0.5, %v1348_v50  ;;  %v1387_v49 = vmul.f32 %v1371_v45, %v3578_v44 }
 0xbeb   :  { %1412 = vrot.lane.b32.xlu1 %v2817_v37, %s2935_s0  ;;  %v1384_v37 = vmul.f32 %v1368_v10, %v3570_v6 }
 0xbec   :  { %1410 = vrot.lane.b32.xlu0 %v2819_v13, %s2935_s0  ;;  %v1369_v13 = vrot.slane %v3460_v3, 7 }
 0xbee   :  { %v1385_v59 = vmul.f32 %v1369_v13, %v3575_v17 }
 0xc51   :  { %v1407_v54 = vpop.permute.xlu1 %1406 }
 0xc52   :  { %v1426_v28 = vmul.f32 %v1407_v54, %v3560_v52  ;;  %v1399_v18 = vpop.permute.xlu0 %1398 }
 0xc53   :  { %v1422_v55 = vmul.f32 %v1399_v18, %v3562_v47 }
 0xc54   :  { %1446 = vrot.lane.b32.xlu1 %v1426_v28, %s2939_s14  ;;  %v1373_v28 = vrot.slane %v3491_v39, 7 }
 0xc55   :  { %v1401_v62 = vpop.permute.xlu1 %1400  ;;  %1438 = vrot.lane.b32.xlu0 %v1422_v55, %s2939_s14  ;;  %v1372_v55 = vrot.slane %v3489_v4, 7 }
 0xc56   :  { %v1423_v60 = vmul.f32 %v1401_v62, %v3567_v53  ;;  %v1403_v33 = vpop.permute.xlu0 %1402  ;;  %v1389_v43 = vmul.f32 %v1373_v28, %v3583_v15 }
 0xc57   :  { %v1424_v7 = vmul.f32 %v1403_v33, %v3570_v6  ;;  %v1388_v38 = vmul.f32 %v1372_v55, %v3586_v36 }
 0xc58   :  { %1440 = vrot.lane.b32.xlu1 %v1423_v60, %s2939_s14 }
 0xc59   :  { %v1405_v51 = vpop.permute.xlu1 %1404  ;;  %1442 = vrot.lane.b32.xlu0 %v1424_v7, %s2939_s14 }
 0xc5a   :  { %v1425_v22 = vmul.f32 %v1405_v51, %v3575_v17  ;;  %v1409_v46 = vpop.permute.xlu0 %1408 }
 0xc5b   :  { %v1427_v34 = vmul.f32 %v1409_v46, %v3578_v44 }
 0xc5c   :  { %1444 = vrot.lane.b32.xlu1 %v1425_v22, %s2939_s14 }
 0xc5d   :  { %v1413_v61 = vpop.permute.xlu1 %1412  ;;  %1448 = vrot.lane.b32.xlu0 %v1427_v34, %s2939_s14 }
 0xc5e   :  { %v1429_v35 = vmul.f32 %v1413_v61, %v3583_v15  ;;  %v1411_v31 = vpop.permute.xlu0 %1410 }
 0xc5f   :  { %v1428_v23 = vmul.f32 %v1411_v31, %v3586_v36 }
 0xc60   :  { %1452 = vrot.lane.b32.xlu1 %v1429_v35, %s2939_s14 }
 0xc61   :  { %1450 = vrot.lane.b32.xlu0 %v1428_v23, %s2939_s14 }
 0xcc6   :  { %v1447_v42 = vpop.permute.xlu1 %1446 }
 0xcc7   :  { %v3597_v5 = vadd.f32 %v1447_v42, %v1386_v57  ;;  %v1439_v0 = vpop.permute.xlu0 %1438 }
 0xcc8   :  { %v3600_v20 = vadd.f32 %v1439_v0, %v1382_v63 }
 0xcc9   :  { %2820 = vtanh.f32 %v3597_v5 }
 0xcca   :  { %2822 = vtanh.f32 %v3600_v20  ;;  %v1441_v1 = vpop.permute.xlu1 %1440 }
 0xccb   :  { %v3607_v40 = vadd.f32 %v1441_v1, %v1383_v21  ;;  %v1443_v8 = vpop.permute.xlu0 %1442 }
 0xccc   :  { %v3610_v27 = vadd.f32 %v1443_v8, %v1384_v37 }
 0xccd   :  { %2824 = vtanh.f32 %v3607_v40 }
 0xcce   :  { %2826 = vtanh.f32 %v3610_v27  ;;  %v1445_v54 = vpop.permute.xlu1 %1444 }
 0xccf   :  { %v3617_v18 = vadd.f32 %v1445_v54, %v1385_v59  ;;  %v1449_v3 = vpop.permute.xlu0 %1448 }
 0xcd0   :  { %v3620_v2 = vadd.f32 %v1449_v3, %v1387_v49 }
 0xcd1   :  { %2828 = vtanh.f32 %v3617_v18 }
 0xcd2   :  { %2830 = vtanh.f32 %v3620_v2  ;;  %v1453_v62 = vpop.permute.xlu1 %1452 }
 0xcd3   :  { %v2821_v60 = vpop.eup %2820  ;;  %v3626_v33 = vadd.f32 %v1453_v62, %v1389_v43  ;;  %v1451_v39 = vpop.permute.xlu0 %1450 }
 0xcd4   :  { %v2823_v7 = vpop.eup %2822  ;;  %1494 = vrot.lane.b32.xlu1 %v2821_v60, %s2935_s0  ;;  %v3629_v56 = vadd.f32 %v1451_v39, %v1388_v38 }
 0xcd5   :  { %2832 = vtanh.f32 %v3626_v33  ;;  %1486 = vrot.lane.b32.xlu0 %v2823_v7, %s2935_s0 }
 0xcd6   :  { %2834 = vtanh.f32 %v3629_v56 }
 0xcd7   :  { %v2825_v4 = vpop.eup %2824 }
 0xcd8   :  { %v2827_v51 = vpop.eup %2826  ;;  %1488 = vrot.lane.b32.xlu1 %v2825_v4, %s2935_s0 }
 0xcd9   :  { %1490 = vrot.lane.b32.xlu0 %v2827_v51, %s2935_s0 }
 0xcdb   :  { %v2829_v50 = vpop.eup %2828 }
 0xcdc   :  { %v2831_v22 = vpop.eup %2830  ;;  %1492 = vrot.lane.b32.xlu1 %v2829_v50, %s2935_s0 }
 0xcdd   :  { %1496 = vrot.lane.b32.xlu0 %v2831_v22, %s2935_s0 }
 0xcdf   :  { %v2833_v46 = vpop.eup %2832 }
 0xce0   :  { %v2835_v34 = vpop.eup %2834  ;;  %1500 = vrot.lane.b32.xlu1 %v2833_v46, %s2935_s0 }
 0xce1   :  { %1498 = vrot.lane.b32.xlu0 %v2835_v34, %s2935_s0 }
 0xd46   :  { %v1495_v61 = vpop.permute.xlu1 %1494 }
 0xd47   :  { %v1487_v35 = vpop.permute.xlu0 %1486  ;;  %v1514_v0 = vmul.f32 %v1495_v61, %v3560_v52 }
 0xd48   :  { %v1510_v31 = vmul.f32 %v1487_v35, %v3562_v47 }
 0xd4a   :  { %v1518_v23 = vpack.c.bf16 %v1510_v31, %v1510_v31  ;;  %v1489_v32 = vpop.permute.xlu1 %1488 }
 0xd4b   :  { %v1511_v48 = vmul.f32 %v1489_v32, %v3567_v53  ;;  %v1491_v57 = vpop.permute.xlu0 %1490  ;;  %v1522_v53 = vpack.c.bf16 %v1514_v0, %v1514_v0 }
 0xd4c   :  { %v1512_v42 = vmul.f32 %v1491_v57, %v3570_v6  ;;  %v1534_v63 = vunpack.c.l.b16 %v1518_v23 }
 0xd4d   :  { %v1519_v41 = vpack.c.bf16 %v1511_v48, %v1511_v48  ;;  %v1538_v39 = vunpack.c.l.b16 %v1522_v53 }
 0xd4e   :  { %v1520_v10 = vpack.c.bf16 %v1512_v42, %v1512_v42  ;;  %v1493_v21 = vpop.permute.xlu1 %1492  ;;  %v1542_v45 = vrot.slane %v1534_v63, 4 }
 0xd4f   :  { %v1535_v1 = vunpack.c.l.b16 %v1519_v41  ;;  %v1513_v37 = vmul.f32 %v1493_v21, %v3575_v17  ;;  %v1497_v13 = vpop.permute.xlu0 %1496 }
 0xd50   :  { %v1536_v8 = vunpack.c.l.b16 %v1520_v10  ;;  %v1515_v47 = vmul.f32 %v1497_v13, %v3578_v44 }
 0xd51   :  { %v1543_v59 = vrot.slane %v1535_v1, 3  ;;  %v1521_v54 = vpack.c.bf16 %v1513_v37, %v1513_v37 }
 0xd52   :  { %v1545_v49 = vrot.slane %v1536_v8, 2  ;;  %v1523_v28 = vpack.c.bf16 %v1515_v47, %v1515_v47  ;;  %v1501_v6 = vpop.permute.xlu1 %1500 }
 0xd53   :  { %v1544_v3 = vsel %vm308_vm5, %v1543_v59, %v1542_v45  ;;  %v1537_v55 = vunpack.c.l.b16 %v1521_v54  ;;  %v1517_v52 = vmul.f32 %v1501_v6, %v3583_v15  ;;  %v1499_v43 = vpop.permute.xlu0 %1498 }
 0xd54   :  { %v1546_v62 = vsel %vm311_vm6, %v1545_v49, %v1544_v3  ;;  %v1539_v17 = vunpack.c.l.b16 %v1523_v28  ;;  %v1516_v38 = vmul.f32 %v1499_v43, %v3586_v36 }
 0xd55   :  { %v1547_v60 = vrot.slane %v1537_v55, 1  ;;  %v1525_v44 = vpack.c.bf16 %v1517_v52, %v1517_v52 }
 0xd56   :  { %v1524_v7 = vpack.c.bf16 %v1516_v38, %v1516_v38  ;;  %v1550_v51 = vrot.slane %v1539_v17, 7 }
 0xd57   :  { %v1548_v4 = vsel %vm314_vm7, %v1547_v60, %v1546_v62  ;;  %v1541_v50 = vunpack.c.l.b16 %v1525_v44 }
 0xd58   :  { %v1549_v22 = vsel %vm317_vm8, %v1538_v39, %v1548_v4  ;;  %v1540_v46 = vunpack.c.l.b16 %v1524_v7 }
 0xd59   :  { %v1551_v15 = vsel %vm320_vm9, %v1550_v51, %v1549_v22  ;;  %v1554_v61 = vrot.slane %v1541_v50, 5 }
 0xd5a   :  { %v1552_v34 = vrot.slane %v1540_v46, 6 }
 0xd5c   :  { %v1553_v35 = vsel %vm323_vm10, %v1552_v34, %v1551_v15 }
 0xd5d   :  { %v1555_v31 = vsel %vm326_vm11, %v1554_v61, %v1553_v35 }
 0xd5e   :  { %v1556_v36 = vpack.c.b16 %v1555_v31, %v1555_v31 }
 0xd60   :  { %1557 = vrot.lane.b32.xlu0 %v1556_v36, %s2939_s14 }
 0xdd2   :  { %v1558_v23 = vpop.permute.xlu0 %1557 }
 0xdd3   :  { %2633 = vmatmul.mubr.msk.bf16.vlgmr.msra.gmra.mrb[12].mxu0 %vm79_vm0, %v1558_v23 }
 0xdd4   :  { %2645 = vmatpush3.bf16.msra.mxu0 %v3523_v58  ;;  %2648 = vmatprep.mubr.msk.bf16.mxu0 %vm2938_vm4, %v2937_v24 }
 0xdd5   :  { %2646 = vmatprep.subr.bf16.mxu0 %v2937_v24 }
 0xdd8   :  { %2647 = vmatpush3.bf16.msra.mxu0 %v3532_v9 }
 0xea6   :  { %v1596_v32 = vpop.f32.mrb[12].mxu0 }
 0xea7   :  { %v1603_v48 = vrot.slane %v1596_v32, 3  ;;  %v1604_v57 = vrot.slane %v1596_v32, 4  ;;  %v1605_v42 = vrot.slane %v1596_v32, 5  ;;  %v1606_v63 = vrot.slane %v1596_v32, 6  ;;  %v2634_v41 = vpop.f32.mrb[13].mxu0 }
 0xea8   :  { %v1599_v0 = vpop.f32.mrb[14].mxu0  ;;  %v1607_v10 = vrot.slane %v1596_v32, 7  ;;  %v1608_v13 = vrot.slane %v1596_v32, 1  ;;  %v1609_v54 = vrot.slane %v1596_v32, 2  ;;  %v1623_v28 = vadd.f32 %v1596_v32, %v3024_v30 }
 0xea9   :  { %v1618_v21 = vadd.f32 %v1603_v48, %v3004_v14  ;;  %v1619_v1 = vadd.f32 %v1604_v57, %v3010_v19  ;;  %v1620_v58 = vadd.f32 %v1605_v42, %v3002_v12  ;;  %v2635_v37 = vpop.f32.mrb[15].mxu0  ;;  %v1621_v8 = vadd.f32 %v1606_v63, %v3006_v16 }
 0xeaa   :  { %v1622_v45 = vadd.f32 %v1607_v10, %v3020_v26  ;;  %v1624_v53 = vadd.f32 %v1608_v13, %v3018_v25  ;;  %v1625_v3 = vadd.f32 %v1609_v54, %v3022_v29  ;;  %v1631_v52 = vmul.f32 %v1623_v28, %v3000_v11 }
 0xeab   :  { %v1626_v9 = vmul.f32 %v1618_v21, %v3000_v11  ;;  %v1627_v47 = vmul.f32 %v1619_v1, %v3000_v11  ;;  %v1628_v59 = vmul.f32 %v1620_v58, %v3000_v11  ;;  %v1629_v49 = vmul.f32 %v1621_v8, %v3000_v11 }
 0xeac   :  { %v1630_v6 = vmul.f32 %v1622_v45, %v3000_v11  ;;  %v1632_v55 = vmul.f32 %v1624_v53, %v3000_v11  ;;  %v1633_v43 = vmul.f32 %v1625_v3, %v3000_v11  ;;  %v1666_v28 = vrot.slane %v3600_v20, 7 }
 0xead   :  { %2836 = vtanh.f32 %v1626_v9 }
 0xeae   :  { %2838 = vtanh.f32 %v1627_v47 }
 0xeaf   :  { %2840 = vtanh.f32 %v1628_v59 }
 0xeb0   :  { %2842 = vtanh.f32 %v1629_v49 }
 0xeb1   :  { %2844 = vtanh.f32 %v1630_v6  ;;  %v1667_v6 = vrot.slane %v3607_v40, 7 }
 0xeb2   :  { %2846 = vtanh.f32 %v1632_v55 }
 0xeb3   :  { %2848 = vtanh.f32 %v1631_v52 }
 0xeb4   :  { %2850 = vtanh.f32 %v1633_v43  ;;  %v1668_v43 = vrot.slane %v3610_v27, 7 }
 0xeb7   :  { %v2837_v62 = vpop.eup %2836 }
 0xeb8   :  { %v2839_v17 = vpop.eup %2838  ;;  %1698 = vrot.lane.b32.xlu1 %v2837_v62, %s2935_s0  ;;  %v1642_v51 = vmul.f32 0.5, %v2837_v62 }
 0xeb9   :  { %1700 = vrot.lane.b32.xlu0 %v2839_v17, %s2935_s0  ;;  %v2841_v38 = vpop.eup %2840  ;;  %v1643_v50 = vmul.f32 0.5, %v2839_v17 }
 0xeba   :  { %v2843_v60 = vpop.eup %2842  ;;  %v3686_v22 = vadd.f32 0.5, %v1642_v51  ;;  %v1644_v46 = vmul.f32 0.5, %v2841_v38 }
 0xebb   :  { %v2845_v44 = vpop.eup %2844  ;;  %v3688_v34 = vadd.f32 0.5, %v1643_v50  ;;  %v1645_v61 = vmul.f32 0.5, %v2843_v60 }
 0xebc   :  { %1702 = vrot.lane.b32.xlu1 %v2841_v38, %s2935_s0  ;;  %v2847_v39 = vpop.eup %2846  ;;  %v3693_v23 = vadd.f32 0.5, %v1644_v46  ;;  %v1646_v32 = vmul.f32 0.5, %v2845_v44  ;;  %v1682_v3 = vmul.f32 %v1666_v28, %v3686_v22  ;;  %v1669_v38 = vrot.slane %v3617_v18, 7 }
 0xebd   :  { %1704 = vrot.lane.b32.xlu0 %v2843_v60, %s2935_s0  ;;  %v2849_v7 = vpop.eup %2848  ;;  %v3696_v48 = vadd.f32 0.5, %v1645_v61  ;;  %v1648_v42 = vmul.f32 0.5, %v2847_v39  ;;  %v1683_v55 = vmul.f32 %v1667_v6, %v3688_v34 }
 0xebe   :  { %v2851_v4 = vpop.eup %2850  ;;  %v3701_v10 = vadd.f32 0.5, %v1646_v32  ;;  %v1647_v21 = vmul.f32 0.5, %v2849_v7  ;;  %v1684_v20 = vmul.f32 %v1668_v43, %v3693_v23 }
 0xebf   :  { %v3704_v1 = vadd.f32 0.5, %v1648_v42  ;;  %v1649_v37 = vmul.f32 0.5, %v2851_v4  ;;  %v1685_v40 = vmul.f32 %v1669_v38, %v3696_v48 }
 0xec0   :  { %1706 = vrot.lane.b32.xlu1 %v2845_v44, %s2935_s0  ;;  %v3709_v47 = vadd.f32 0.5, %v1647_v21 }
 0xec1   :  { %1710 = vrot.lane.b32.xlu0 %v2847_v39, %s2935_s0  ;;  %v3712_v45 = vadd.f32 0.5, %v1649_v37  ;;  %v1670_v39 = vrot.slane %v3597_v5, 7 }
 0xec3   :  { %v1686_v18 = vmul.f32 %v1670_v39, %v3701_v10 }
 0xec4   :  { %1708 = vrot.lane.b32.xlu1 %v2849_v7, %s2935_s0 }
 0xec5   :  { %1712 = vrot.lane.b32.xlu0 %v2851_v4, %s2935_s0  ;;  %v1672_v4 = vrot.slane %v3629_v56, 7 }
 0xec7   :  { %v1688_v50 = vmul.f32 %v1672_v4, %v3704_v1 }
 0xf2a   :  { %v1699_v15 = vpop.permute.xlu1 %1698 }
 0xf2b   :  { %v1701_v35 = vpop.permute.xlu0 %1700  ;;  %v1722_v31 = vmul.f32 %v1699_v15, %v3686_v22  ;;  %v1671_v15 = vrot.slane %v3620_v2, 7 }
 0xf2c   :  { %v1723_v36 = vmul.f32 %v1701_v35, %v3688_v34  ;;  %v1673_v35 = vrot.slane %v3626_v33, 7 }
 0xf2d   :  { %1738 = vrot.lane.b32.xlu1 %v1722_v31, %s2939_s14  ;;  %v1687_v56 = vmul.f32 %v1671_v15, %v3709_v47 }
 0xf2e   :  { %1740 = vrot.lane.b32.xlu0 %v1723_v36, %s2939_s14  ;;  %v1703_v57 = vpop.permute.xlu1 %1702  ;;  %v1689_v36 = vmul.f32 %v1673_v35, %v3712_v45 }
 0xf2f   :  { %v1705_v63 = vpop.permute.xlu0 %1704  ;;  %v1724_v41 = vmul.f32 %v1703_v57, %v3693_v23 }
 0xf30   :  { %v1725_v0 = vmul.f32 %v1705_v63, %v3696_v48 }
 0xf31   :  { %1742 = vrot.lane.b32.xlu1 %v1724_v41, %s2939_s14 }
 0xf32   :  { %1744 = vrot.lane.b32.xlu0 %v1725_v0, %s2939_s14  ;;  %v1707_v58 = vpop.permute.xlu1 %1706 }
 0xf33   :  { %v1711_v13 = vpop.permute.xlu0 %1710  ;;  %v1726_v8 = vmul.f32 %v1707_v58, %v3701_v10 }
 0xf34   :  { %v1728_v9 = vmul.f32 %v1711_v13, %v3704_v1 }
 0xf35   :  { %1746 = vrot.lane.b32.xlu1 %v1726_v8, %s2939_s14 }
 0xf36   :  { %1750 = vrot.lane.b32.xlu0 %v1728_v9, %s2939_s14  ;;  %v1709_v59 = vpop.permute.xlu1 %1708 }
 0xf37   :  { %v1713_v54 = vpop.permute.xlu0 %1712  ;;  %v1727_v53 = vmul.f32 %v1709_v59, %v3709_v47 }
 0xf38   :  { %v1729_v49 = vmul.f32 %v1713_v54, %v3712_v45 }
 0xf39   :  { %1748 = vrot.lane.b32.xlu1 %v1727_v53, %s2939_s14 }
 0xf3a   :  { %1752 = vrot.lane.b32.xlu0 %v1729_v49, %s2939_s14 }
 0xf9f   :  { %v1739_v52 = vpop.permute.xlu1 %1738 }
 0xfa0   :  { %v1741_v62 = vpop.permute.xlu0 %1740  ;;  %v3723_v17 = vadd.f32 %v1739_v52, %v1682_v3 }
 0xfa1   :  { %v3726_v60 = vadd.f32 %v1741_v62, %v1683_v55 }
 0xfa2   :  { %2852 = vtanh.f32 %v3723_v17 }
 0xfa3   :  { %2854 = vtanh.f32 %v3726_v60  ;;  %v1743_v44 = vpop.permute.xlu1 %1742 }
 0xfa4   :  { %v1745_v7 = vpop.permute.xlu0 %1744  ;;  %v3733_v27 = vadd.f32 %v1743_v44, %v1684_v20 }
 0xfa5   :  { %v3736_v51 = vadd.f32 %v1745_v7, %v1685_v40 }
 0xfa6   :  { %2856 = vtanh.f32 %v3733_v27 }
 0xfa7   :  { %2858 = vtanh.f32 %v3736_v51  ;;  %v1747_v46 = vpop.permute.xlu1 %1746 }
 0xfa8   :  { %v1751_v61 = vpop.permute.xlu0 %1750  ;;  %v3743_v5 = vadd.f32 %v1747_v46, %v1686_v18 }
 0xfa9   :  { %v3746_v31 = vadd.f32 %v1751_v61, %v1688_v50 }
 0xfaa   :  { %2860 = vtanh.f32 %v3743_v5 }
 0xfab   :  { %2862 = vtanh.f32 %v3746_v31  ;;  %v1749_v32 = vpop.permute.xlu1 %1748 }
 0xfac   :  { %v2853_v57 = vpop.eup %2852  ;;  %v1753_v42 = vpop.permute.xlu0 %1752  ;;  %v3752_v63 = vadd.f32 %v1749_v32, %v1687_v56 }
 0xfad   :  { %v2855_v2 = vpop.eup %2854  ;;  %v3754_v41 = vadd.f32 %v1753_v42, %v1689_v36  ;;  %1786 = vrot.lane.b32.xlu1 %v2853_v57, %s2935_s0 }
 0xfae   :  { %2864 = vtanh.f32 %v3752_v63  ;;  %1788 = vrot.lane.b32.xlu0 %v2855_v2, %s2935_s0 }
 0xfaf   :  { %2866 = vtanh.f32 %v3754_v41 }
 0xfb0   :  { %v2857_v33 = vpop.eup %2856 }
 0xfb1   :  { %v2859_v0 = vpop.eup %2858  ;;  %1790 = vrot.lane.b32.xlu1 %v2857_v33, %s2935_s0 }
 0xfb2   :  { %1792 = vrot.lane.b32.xlu0 %v2859_v0, %s2935_s0 }
 0xfb4   :  { %v2861_v21 = vpop.eup %2860 }
 0xfb5   :  { %v2863_v58 = vpop.eup %2862  ;;  %1794 = vrot.lane.b32.xlu1 %v2861_v21, %s2935_s0 }
 0xfb6   :  { %1798 = vrot.lane.b32.xlu0 %v2863_v58, %s2935_s0 }
 0xfb8   :  { %v2865_v37 = vpop.eup %2864 }
 0xfb9   :  { %v2867_v13 = vpop.eup %2866  ;;  %1796 = vrot.lane.b32.xlu1 %v2865_v37, %s2935_s0 }
 0xfba   :  { %1800 = vrot.lane.b32.xlu0 %v2867_v13, %s2935_s0 }
0x101f   :  { %v1787_v8 = vpop.permute.xlu1 %1786 }
0x1020   :  { %v1789_v9 = vpop.permute.xlu0 %1788  ;;  %v1810_v59 = vmul.f32 %v1787_v8, %v3686_v22 }
0x1021   :  { %v1811_v54 = vmul.f32 %v1789_v9, %v3688_v34 }
0x1022   :  { %v1818_v53 = vpack.c.bf16 %v1810_v59, %v1810_v59 }
0x1023   :  { %v1819_v49 = vpack.c.bf16 %v1811_v54, %v1811_v54  ;;  %v1791_v28 = vpop.permute.xlu1 %1790 }
0x1024   :  { %v1834_v6 = vunpack.c.l.b16 %v1818_v53  ;;  %v1793_v3 = vpop.permute.xlu0 %1792  ;;  %v1812_v55 = vmul.f32 %v1791_v28, %v3693_v23 }
0x1025   :  { %v1835_v52 = vunpack.c.l.b16 %v1819_v49  ;;  %v1813_v43 = vmul.f32 %v1793_v3, %v3696_v48 }
0x1026   :  { %v1820_v62 = vpack.c.bf16 %v1812_v55, %v1812_v55  ;;  %v1842_v20 = vrot.slane %v1834_v6, 5 }
0x1027   :  { %v1843_v38 = vrot.slane %v1835_v52, 4  ;;  %v1821_v40 = vpack.c.bf16 %v1813_v43, %v1813_v43  ;;  %v1795_v44 = vpop.permute.xlu1 %1794 }
0x1028   :  { %v1836_v39 = vunpack.c.l.b16 %v1820_v62  ;;  %v1799_v7 = vpop.permute.xlu0 %1798  ;;  %v1814_v22 = vmul.f32 %v1795_v44, %v3701_v10 }
0x1029   :  { %v1837_v34 = vunpack.c.l.b16 %v1821_v40  ;;  %v1816_v4 = vmul.f32 %v1799_v7, %v3704_v1  ;;  %v1844_v46 = vsel %vm308_vm5, %v1843_v38, %v1842_v20 }
0x102a   :  { %v1845_v18 = vrot.slane %v1836_v39, 3  ;;  %v1822_v50 = vpack.c.bf16 %v1814_v22, %v1814_v22 }
0x102b   :  { %v1847_v23 = vrot.slane %v1837_v34, 2  ;;  %v1824_v15 = vpack.c.bf16 %v1816_v4, %v1816_v4  ;;  %v1797_v61 = vpop.permute.xlu1 %1796 }
0x102c   :  { %v1846_v48 = vsel %vm311_vm6, %v1845_v18, %v1844_v46  ;;  %v1838_v35 = vunpack.c.l.b16 %v1822_v50  ;;  %v1801_v56 = vpop.permute.xlu0 %1800  ;;  %v1815_v36 = vmul.f32 %v1797_v61, %v3709_v47 }
0x102d   :  { %v1840_v32 = vunpack.c.l.b16 %v1824_v15  ;;  %v1817_v57 = vmul.f32 %v1801_v56, %v3712_v45  ;;  %v1848_v1 = vsel %vm314_vm7, %v1847_v23, %v1846_v48 }
0x102e   :  { %v1849_v10 = vrot.slane %v1838_v35, 1  ;;  %v1823_v42 = vpack.c.bf16 %v1815_v36, %v1815_v36 }
0x102f   :  { %v1825_v2 = vpack.c.bf16 %v1817_v57, %v1817_v57  ;;  %v1852_v21 = vrot.slane %v1840_v32, 7 }
0x1030   :  { %v1850_v33 = vsel %vm317_vm8, %v1849_v10, %v1848_v1  ;;  %v1839_v0 = vunpack.c.l.b16 %v1823_v42 }
0x1031   :  { %v1841_v58 = vunpack.c.l.b16 %v1825_v2 }
0x1032   :  { %v1851_v37 = vsel %vm320_vm9, %v1839_v0, %v1850_v33 }
0x1033   :  { %v1854_v13 = vrot.slane %v1841_v58, 6  ;;  %v1853_v8 = vsel %vm323_vm10, %v1852_v21, %v1851_v37 }
0x1035   :  { %v1855_v47 = vsel %vm326_vm11, %v1854_v13, %v1853_v8 }
0x1036   :  { %v1856_v9 = vpack.c.b16 %v1855_v47, %v1855_v47 }
0x1038   :  { %1857 = vrot.lane.b32.xlu1 %v1856_v9, %s2939_s14 }
0x10aa   :  { %v1858_v45 = vpop.permute.xlu1 %1857 }
0x10ab   :  { %2641 = vmatmul.mubr.msk.bf16.vlgmr.msra.gmra.mrb[12].mxu1 %vm79_vm0, %v1858_v45 }
0x10ac   :  { %2656 = vmatprep.mubr.msk.bf16.mxu1 %vm2938_vm4, %v2937_v24 }
0x117e   :  { %v1896_v59 = vpop.f32.mrb[12].mxu1 }
0x117f   :  { %v1903_v54 = vrot.slane %v1896_v59, 2  ;;  %v1904_v53 = vrot.slane %v1896_v59, 3  ;;  %v1905_v49 = vrot.slane %v1896_v59, 4  ;;  %v1906_v28 = vrot.slane %v1896_v59, 5  ;;  %v2642_v6 = vpop.f32.mrb[13].mxu1 }
0x1180   :  { %v1899_v3 = vpop.f32.mrb[14].mxu1  ;;  %v1907_v55 = vrot.slane %v1896_v59, 6  ;;  %v1908_v20 = vrot.slane %v1896_v59, 7  ;;  %v1909_v7 = vrot.slane %v1896_v59, 1  ;;  %v1924_v23 = vadd.f32 %v1896_v59, %v3018_v25 }
0x1181   :  { %v1918_v52 = vadd.f32 %v1903_v54, %v3004_v14  ;;  %v1919_v43 = vadd.f32 %v1904_v53, %v3010_v19  ;;  %v1920_v62 = vadd.f32 %v1905_v49, %v3002_v12  ;;  %v2643_v38 = vpop.f32.mrb[15].mxu1  ;;  %v1921_v40 = vadd.f32 %v1906_v28, %v3006_v16 }
0x1182   :  { %v1922_v22 = vadd.f32 %v1907_v55, %v3020_v26  ;;  %v1923_v4 = vadd.f32 %v1908_v20, %v3024_v30  ;;  %v1925_v50 = vadd.f32 %v1909_v7, %v3022_v29  ;;  %v1932_v48 = vmul.f32 %v1924_v23, %v3000_v11 }
0x1183   :  { %v1926_v44 = vmul.f32 %v1918_v52, %v3000_v11  ;;  %v1927_v39 = vmul.f32 %v1919_v43, %v3000_v11  ;;  %v1928_v34 = vmul.f32 %v1920_v62, %v3000_v11  ;;  %v1929_v18 = vmul.f32 %v1921_v40, %v3000_v11 }
0x1184   :  { %v1930_v46 = vmul.f32 %v1922_v22, %v3000_v11  ;;  %v1931_v15 = vmul.f32 %v1923_v4, %v3000_v11  ;;  %v1933_v61 = vmul.f32 %v1925_v50, %v3000_v11  ;;  %v1966_v50 = vrot.slane %v3723_v17, 7 }
0x1185   :  { %2868 = vtanh.f32 %v1926_v44 }
0x1186   :  { %2870 = vtanh.f32 %v1927_v39 }
0x1187   :  { %2872 = vtanh.f32 %v1928_v34 }
0x1188   :  { %2874 = vtanh.f32 %v1929_v18 }
0x1189   :  { %2876 = vtanh.f32 %v1930_v46  ;;  %v1967_v46 = vrot.slane %v3726_v60, 7 }
0x118a   :  { %2878 = vtanh.f32 %v1931_v15 }
0x118b   :  { %2880 = vtanh.f32 %v1933_v61 }
0x118c   :  { %2882 = vtanh.f32 %v1932_v48  ;;  %v1968_v48 = vrot.slane %v3733_v27, 7 }
0x118f   :  { %v2869_v35 = vpop.eup %2868 }
0x1190   :  { %v2871_v56 = vpop.eup %2870  ;;  %1998 = vrot.lane.b32.xlu0 %v2869_v35, %s2935_s0  ;;  %v1942_v2 = vmul.f32 0.5, %v2869_v35 }
0x1191   :  { %2000 = vrot.lane.b32.xlu1 %v2871_v56, %s2935_s0  ;;  %v2873_v36 = vpop.eup %2872  ;;  %v1943_v33 = vmul.f32 0.5, %v2871_v56 }
0x1192   :  { %v2875_v32 = vpop.eup %2874  ;;  %v3809_v0 = vadd.f32 0.5, %v1942_v2  ;;  %v1944_v21 = vmul.f32 0.5, %v2873_v36 }
0x1193   :  { %v2877_v57 = vpop.eup %2876  ;;  %v3811_v58 = vadd.f32 0.5, %v1943_v33  ;;  %v1945_v13 = vmul.f32 0.5, %v2875_v32 }
0x1194   :  { %2002 = vrot.lane.b32.xlu0 %v2873_v36, %s2935_s0  ;;  %v2879_v10 = vpop.eup %2878  ;;  %v3816_v45 = vadd.f32 0.5, %v1944_v21  ;;  %v1946_v59 = vmul.f32 0.5, %v2877_v57  ;;  %v1982_v23 = vmul.f32 %v1966_v50, %v3809_v0  ;;  %v1969_v36 = vrot.slane %v3736_v51, 7 }
0x1195   :  { %2004 = vrot.lane.b32.xlu1 %v2875_v32, %s2935_s0  ;;  %v2881_v42 = vpop.eup %2880  ;;  %v3819_v54 = vadd.f32 0.5, %v1945_v13  ;;  %v1947_v49 = vmul.f32 0.5, %v2879_v10  ;;  %v1983_v15 = vmul.f32 %v1967_v46, %v3811_v58 }
0x1196   :  { %v2883_v1 = vpop.eup %2882  ;;  %v3824_v55 = vadd.f32 0.5, %v1946_v59  ;;  %v1949_v52 = vmul.f32 0.5, %v2881_v42  ;;  %v1984_v17 = vmul.f32 %v1968_v48, %v3816_v45 }
0x1197   :  { %v3827_v43 = vadd.f32 0.5, %v1947_v49  ;;  %v1948_v38 = vmul.f32 0.5, %v2883_v1  ;;  %v1985_v60 = vmul.f32 %v1969_v36, %v3819_v54 }
0x1198   :  { %2006 = vrot.lane.b32.xlu0 %v2877_v57, %s2935_s0  ;;  %v3832_v39 = vadd.f32 0.5, %v1949_v52 }
0x1199   :  { %2008 = vrot.lane.b32.xlu1 %v2879_v10, %s2935_s0  ;;  %v3835_v7 = vadd.f32 0.5, %v1948_v38  ;;  %v1970_v10 = vrot.slane %v3743_v5, 7 }
0x119b   :  { %v1986_v51 = vmul.f32 %v1970_v10, %v3824_v55 }
0x119c   :  { %2012 = vrot.lane.b32.xlu0 %v2881_v42, %s2935_s0 }
0x119d   :  { %2010 = vrot.lane.b32.xlu1 %v2883_v1, %s2935_s0  ;;  %v1971_v1 = vrot.slane %v3752_v63, 7 }
0x119f   :  { %v1987_v33 = vmul.f32 %v1971_v1, %v3827_v43 }
0x1202   :  { %v1999_v37 = vpop.permute.xlu0 %1998 }
0x1203   :  { %v2001_v8 = vpop.permute.xlu1 %2000  ;;  %v2022_v47 = vmul.f32 %v1999_v37, %v3809_v0  ;;  %v1973_v37 = vrot.slane %v3754_v41, 7 }
0x1204   :  { %v2023_v9 = vmul.f32 %v2001_v8, %v3811_v58  ;;  %v1972_v8 = vrot.slane %v3746_v31, 7 }
0x1205   :  { %2038 = vrot.lane.b32.xlu0 %v2022_v47, %s2939_s14  ;;  %v1989_v63 = vmul.f32 %v1973_v37, %v3832_v39 }
0x1206   :  { %2040 = vrot.lane.b32.xlu1 %v2023_v9, %s2939_s14  ;;  %v2003_v53 = vpop.permute.xlu0 %2002  ;;  %v1988_v9 = vmul.f32 %v1972_v8, %v3835_v7 }
0x1207   :  { %v2005_v28 = vpop.permute.xlu1 %2004  ;;  %v2024_v6 = vmul.f32 %v2003_v53, %v3816_v45 }
0x1208   :  { %v2025_v3 = vmul.f32 %v2005_v28, %v3819_v54 }
0x1209   :  { %2042 = vrot.lane.b32.xlu0 %v2024_v6, %s2939_s14 }
0x120a   :  { %2044 = vrot.lane.b32.xlu1 %v2025_v3, %s2939_s14  ;;  %v2007_v62 = vpop.permute.xlu0 %2006 }
0x120b   :  { %v2009_v20 = vpop.permute.xlu1 %2008  ;;  %v2026_v40 = vmul.f32 %v2007_v62, %v3824_v55 }
0x120c   :  { %v2027_v44 = vmul.f32 %v2009_v20, %v3827_v43 }
0x120d   :  { %2046 = vrot.lane.b32.xlu0 %v2026_v40, %s2939_s14 }
0x120e   :  { %2048 = vrot.lane.b32.xlu1 %v2027_v44, %s2939_s14  ;;  %v2013_v22 = vpop.permute.xlu0 %2012 }
0x120f   :  { %v2011_v34 = vpop.permute.xlu1 %2010  ;;  %v2029_v4 = vmul.f32 %v2013_v22, %v3832_v39 }
0x1210   :  { %v2028_v18 = vmul.f32 %v2011_v34, %v3835_v7 }
0x1211   :  { %2052 = vrot.lane.b32.xlu0 %v2029_v4, %s2939_s14 }
0x1212   :  { %2050 = vrot.lane.b32.xlu1 %v2028_v18, %s2939_s14 }
0x1277   :  { %v2039_v61 = vpop.permute.xlu0 %2038 }
0x1278   :  { %v2041_v35 = vpop.permute.xlu1 %2040  ;;  %v3846_v56 = vadd.f32 %v2039_v61, %v1982_v23 }
0x1279   :  { %v3849_v32 = vadd.f32 %v2041_v35, %v1983_v15 }
0x127a   :  { %2884 = vtanh.f32 %v3846_v56 }
0x127b   :  { %2886 = vtanh.f32 %v3849_v32  ;;  %v2043_v57 = vpop.permute.xlu0 %2042 }
0x127c   :  { %v2045_v42 = vpop.permute.xlu1 %2044  ;;  %v3856_v27 = vadd.f32 %v2043_v57, %v1984_v17 }
0x127d   :  { %v3859_v2 = vadd.f32 %v2045_v42, %v1985_v60 }
0x127e   :  { %2888 = vtanh.f32 %v3856_v27 }
0x127f   :  { %2890 = vtanh.f32 %v3859_v2  ;;  %v2047_v21 = vpop.permute.xlu0 %2046 }
0x1280   :  { %v2049_v13 = vpop.permute.xlu1 %2048  ;;  %v3866_v5 = vadd.f32 %v2047_v21, %v1986_v51 }
0x1281   :  { %v3869_v47 = vadd.f32 %v2049_v13, %v1987_v33 }
0x1282   :  { %2892 = vtanh.f32 %v3866_v5 }
0x1283   :  { %2894 = vtanh.f32 %v3869_v47  ;;  %v2053_v59 = vpop.permute.xlu0 %2052 }
0x1284   :  { %v2885_v53 = vpop.eup %2884  ;;  %v2051_v49 = vpop.permute.xlu1 %2050  ;;  %v3875_v28 = vadd.f32 %v2053_v59, %v1989_v63 }
0x1285   :  { %v2887_v41 = vpop.eup %2886  ;;  %v3877_v6 = vadd.f32 %v2051_v49, %v1988_v9  ;;  %2086 = vrot.lane.b32.xlu0 %v2885_v53, %s2935_s0 }
0x1286   :  { %2896 = vtanh.f32 %v3875_v28  ;;  %2088 = vrot.lane.b32.xlu1 %v2887_v41, %s2935_s0 }
0x1287   :  { %2898 = vtanh.f32 %v3877_v6 }
0x1288   :  { %v2889_v31 = vpop.eup %2888 }
0x1289   :  { %v2891_v3 = vpop.eup %2890  ;;  %2090 = vrot.lane.b32.xlu0 %v2889_v31, %s2935_s0 }
0x128a   :  { %2092 = vrot.lane.b32.xlu1 %v2891_v3, %s2935_s0 }
0x128c   :  { %v2893_v52 = vpop.eup %2892 }
0x128d   :  { %v2895_v62 = vpop.eup %2894  ;;  %2094 = vrot.lane.b32.xlu0 %v2893_v52, %s2935_s0 }
0x128e   :  { %2096 = vrot.lane.b32.xlu1 %v2895_v62, %s2935_s0 }
0x1290   :  { %v2897_v38 = vpop.eup %2896 }
0x1291   :  { %v2899_v20 = vpop.eup %2898  ;;  %2100 = vrot.lane.b32.xlu0 %v2897_v38, %s2935_s0 }
0x1292   :  { %2098 = vrot.lane.b32.xlu1 %v2899_v20, %s2935_s0 }
0x12f7   :  { %v2087_v40 = vpop.permute.xlu0 %2086 }
0x12f8   :  { %v2089_v44 = vpop.permute.xlu1 %2088  ;;  %v2110_v22 = vmul.f32 %v2087_v40, %v3809_v0 }
0x12f9   :  { %v2111_v34 = vmul.f32 %v2089_v44, %v3811_v58 }
0x12fa   :  { %v2118_v4 = vpack.c.bf16 %v2110_v22, %v2110_v22 }
0x12fb   :  { %v2119_v18 = vpack.c.bf16 %v2111_v34, %v2111_v34  ;;  %v2091_v50 = vpop.permute.xlu0 %2090 }
0x12fc   :  { %v2134_v46 = vunpack.c.l.b16 %v2118_v4  ;;  %v2093_v23 = vpop.permute.xlu1 %2092  ;;  %v2112_v15 = vmul.f32 %v2091_v50, %v3816_v45 }
0x12fd   :  { %v2135_v61 = vunpack.c.l.b16 %v2119_v18  ;;  %v2113_v48 = vmul.f32 %v2093_v23, %v3819_v54 }
0x12fe   :  { %v2120_v35 = vpack.c.bf16 %v2112_v15, %v2112_v15  ;;  %v2142_v17 = vrot.slane %v2134_v46, 6 }
0x12ff   :  { %v2143_v36 = vrot.slane %v2135_v61, 5  ;;  %v2121_v60 = vpack.c.bf16 %v2113_v48, %v2113_v48  ;;  %v2095_v57 = vpop.permute.xlu0 %2094 }
0x1300   :  { %v2136_v10 = vunpack.c.l.b16 %v2120_v35  ;;  %v2097_v42 = vpop.permute.xlu1 %2096  ;;  %v2114_v0 = vmul.f32 %v2095_v57, %v3824_v55 }
0x1301   :  { %v2137_v58 = vunpack.c.l.b16 %v2121_v60  ;;  %v2115_v1 = vmul.f32 %v2097_v42, %v3827_v43  ;;  %v2144_v21 = vsel %vm308_vm5, %v2143_v36, %v2142_v17 }
0x1302   :  { %v2145_v51 = vrot.slane %v2136_v10, 4  ;;  %v2122_v33 = vpack.c.bf16 %v2114_v0, %v2114_v0 }
0x1303   :  { %v2147_v45 = vrot.slane %v2137_v58, 3  ;;  %v2123_v37 = vpack.c.bf16 %v2115_v1, %v2115_v1  ;;  %v2101_v13 = vpop.permute.xlu0 %2100 }
0x1304   :  { %v2146_v54 = vsel %vm311_vm6, %v2145_v51, %v2144_v21  ;;  %v2138_v8 = vunpack.c.l.b16 %v2122_v33  ;;  %v2099_v63 = vpop.permute.xlu1 %2098  ;;  %v2117_v9 = vmul.f32 %v2101_v13, %v3832_v39 }
0x1305   :  { %v2139_v59 = vunpack.c.l.b16 %v2123_v37  ;;  %v2116_v53 = vmul.f32 %v2099_v63, %v3835_v7  ;;  %v2148_v43 = vsel %vm314_vm7, %v2147_v45, %v2146_v54 }
0x1306   :  { %v2149_v55 = vrot.slane %v2138_v8, 2  ;;  %v2125_v49 = vpack.c.bf16 %v2117_v9, %v2117_v9 }
0x1307   :  { %v2151_v41 = vrot.slane %v2139_v59, 1  ;;  %v2124_v31 = vpack.c.bf16 %v2116_v53, %v2116_v53 }
0x1308   :  { %v2150_v3 = vsel %vm317_vm8, %v2149_v55, %v2148_v43  ;;  %v2141_v52 = vunpack.c.l.b16 %v2125_v49 }
0x1309   :  { %v2140_v62 = vunpack.c.l.b16 %v2124_v31  ;;  %v2152_v38 = vsel %vm320_vm9, %v2151_v41, %v2150_v3 }
0x130a   :  { %v2154_v20 = vrot.slane %v2141_v52, 7 }
0x130b   :  { %v2153_v40 = vsel %vm323_vm10, %v2140_v62, %v2152_v38 }
0x130c   :  { %v2155_v39 = vsel %vm326_vm11, %v2154_v20, %v2153_v40 }
0x130d   :  { %v2156_v44 = vpack.c.b16 %v2155_v39, %v2155_v39 }
0x130f   :  { %2157 = vrot.lane.b32.xlu0 %v2156_v44, %s2939_s14 }
0x1381   :  { %v2158_v7 = vpop.permute.xlu0 %2157 }
0x1382   :  { %2649 = vmatmul.mubr.msk.bf16.vlgmr.msra.gmra.mrb[16].mxu0 %vm79_vm0, %v2158_v7 }
0x1455   :  { %v2196_v22 = vpop.f32.mrb[16].mxu0 }
0x1456   :  { %v2203_v34 = vrot.slane %v2196_v22, 1  ;;  %v2204_v4 = vrot.slane %v2196_v22, 2  ;;  %v2205_v18 = vrot.slane %v2196_v22, 3  ;;  %v2206_v50 = vrot.slane %v2196_v22, 4  ;;  %v2650_v46 = vpop.f32.mrb[17].mxu0 }
0x1457   :  { %v2199_v23 = vpop.f32.mrb[18].mxu0  ;;  %v2207_v15 = vrot.slane %v2196_v22, 5  ;;  %v2208_v17 = vrot.slane %v2196_v22, 6  ;;  %v2209_v42 = vrot.slane %v2196_v22, 7 }
0x1458   :  { %v2218_v61 = vadd.f32 %v2203_v34, %v3004_v14  ;;  %v2219_v48 = vadd.f32 %v2204_v4, %v3010_v19  ;;  %v2220_v35 = vadd.f32 %v2205_v18, %v3002_v12  ;;  %v2651_v36 = vpop.f32.mrb[19].mxu0  ;;  %v2221_v60 = vadd.f32 %v2206_v50, %v3006_v16 }
0x1459   :  { %v2222_v0 = vadd.f32 %v2207_v15, %v3020_v26  ;;  %v2223_v14 = vadd.f32 %v2208_v17, %v3024_v30  ;;  %v2224_v12 = vadd.f32 %v2209_v42, %v3018_v25  ;;  %v2225_v16 = vadd.f32 %v2196_v22, %v3022_v29 }
0x145a   :  { %v2226_v57 = vmul.f32 %v2218_v61, %v3000_v11  ;;  %v2227_v10 = vmul.f32 %v2219_v48, %v3000_v11  ;;  %v2228_v58 = vmul.f32 %v2220_v35, %v3000_v11  ;;  %v2229_v19 = vmul.f32 %v2221_v60, %v3000_v11 }
0x145b   :  { %v2230_v1 = vmul.f32 %v2222_v0, %v3000_v11  ;;  %v2231_v51 = vmul.f32 %v2223_v14, %v3000_v11  ;;  %v2232_v26 = vmul.f32 %v2224_v12, %v3000_v11  ;;  %v2233_v33 = vmul.f32 %v2225_v16, %v3000_v11 }
0x145c   :  { %2900 = vtanh.f32 %v2226_v57  ;;  %v2266_v17 = vrot.slane %v3846_v56, 7  ;;  %v2267_v60 = vrot.slane %v3849_v32, 7  ;;  %v2268_v0 = vrot.slane %v3856_v27, 7 }
0x145d   :  { %2902 = vtanh.f32 %v2227_v10  ;;  %v2270_v32 = vrot.slane %v3866_v5, 7 }
0x145e   :  { %2904 = vtanh.f32 %v2228_v58 }
0x145f   :  { %2906 = vtanh.f32 %v2229_v19  ;;  %v2269_v19 = vrot.slane %v3859_v2, 7 }
0x1460   :  { %2908 = vtanh.f32 %v2230_v1 }
0x1461   :  { %2910 = vtanh.f32 %v2231_v51 }
0x1462   :  { %2912 = vtanh.f32 %v2232_v26 }
0x1463   :  { %2914 = vtanh.f32 %v2233_v33  ;;  %v2271_v33 = vrot.slane %v3869_v47, 7 }
0x1466   :  { %v2901_v30 = vpop.eup %2900 }
0x1467   :  { %v2903_v21 = vpop.eup %2902  ;;  %2298 = vrot.lane.b32.xlu1 %v2901_v30, %s2935_s0  ;;  %v2242_v54 = vmul.f32 0.5, %v2901_v30 }
0x1468   :  { %2300 = vrot.lane.b32.xlu0 %v2903_v21, %s2935_s0  ;;  %v2905_v25 = vpop.eup %2904  ;;  %v2243_v8 = vmul.f32 0.5, %v2903_v21 }
0x1469   :  { %v2907_v45 = vpop.eup %2906  ;;  %v3930_v63 = vadd.f32 0.5, %v2242_v54  ;;  %v2244_v9 = vmul.f32 0.5, %v2905_v25 }
0x146a   :  { %v2909_v29 = vpop.eup %2908  ;;  %v3932_v59 = vadd.f32 0.5, %v2243_v8  ;;  %v2245_v55 = vmul.f32 0.5, %v2907_v45 }
0x146b   :  { %2302 = vrot.lane.b32.xlu1 %v2905_v25, %s2935_s0  ;;  %v2911_v37 = vpop.eup %2910  ;;  %v3937_v31 = vadd.f32 0.5, %v2244_v9  ;;  %v2246_v3 = vmul.f32 0.5, %v2909_v29  ;;  %v2282_v57 = vmul.f32 %v2266_v17, %v3930_v63  ;;  %v2272_v25 = vrot.slane %v3877_v6, 7 }
0x146c   :  { %2304 = vrot.lane.b32.xlu0 %v2907_v45, %s2935_s0  ;;  %v2913_v11 = vpop.eup %2912  ;;  %v3940_v52 = vadd.f32 0.5, %v2245_v55  ;;  %v2247_v38 = vmul.f32 0.5, %v2911_v37  ;;  %v2283_v10 = vmul.f32 %v2267_v60, %v3932_v59 }
0x146d   :  { %v2915_v13 = vpop.eup %2914  ;;  %v3945_v44 = vadd.f32 0.5, %v2246_v3  ;;  %v2248_v7 = vmul.f32 0.5, %v2913_v11  ;;  %v2284_v1 = vmul.f32 %v2268_v0, %v3937_v31 }
0x146e   :  { %v3948_v22 = vadd.f32 0.5, %v2247_v38  ;;  %v2249_v4 = vmul.f32 0.5, %v2915_v13  ;;  %v2285_v56 = vmul.f32 %v2269_v19, %v3940_v52  ;;  %v2675_v38 = vld [vmem:[%s4021_s4 + $0x8] sm:$0xff]  }
0x146f   :  { %2306 = vrot.lane.b32.xlu1 %v2909_v29, %s2935_s0  ;;  %v3953_v23 = vadd.f32 0.5, %v2248_v7  ;;  %v2286_v27 = vmul.f32 %v2270_v32, %v3945_v44 }
0x1470   :  { %2308 = vrot.lane.b32.xlu0 %v2911_v37, %s2935_s0  ;;  %v3956_v15 = vadd.f32 0.5, %v2249_v4  ;;  %v2287_v2 = vmul.f32 %v2271_v33, %v3948_v22  ;;  %v2273_v37 = vrot.slane %v3875_v28, 7 }
0x1471   :  { %v2288_v5 = vmul.f32 %v2272_v25, %v3953_v23 }
0x1472   :  { %v2289_v47 = vmul.f32 %v2273_v37, %v3956_v15 }
0x1473   :  { %2310 = vrot.lane.b32.xlu1 %v2913_v11, %s2935_s0 }
0x1474   :  { %2312 = vrot.lane.b32.xlu0 %v2915_v13, %s2935_s0 }
0x14d9   :  { %v2299_v53 = vpop.permute.xlu1 %2298 }
0x14da   :  { %v2301_v49 = vpop.permute.xlu0 %2300  ;;  %v2322_v41 = vmul.f32 %v2299_v53, %v3930_v63 }
0x14db   :  { %v2323_v43 = vmul.f32 %v2301_v49, %v3932_v59 }
0x14dc   :  { %2338 = vrot.lane.b32.xlu1 %v2322_v41, %s2939_s14 }
0x14dd   :  { %2340 = vrot.lane.b32.xlu0 %v2323_v43, %s2939_s14  ;;  %v2303_v62 = vpop.permute.xlu1 %2302 }
0x14de   :  { %v2305_v20 = vpop.permute.xlu0 %2304  ;;  %v2324_v40 = vmul.f32 %v2303_v62, %v3937_v31  ;;  %v2674_v62 = vld [vmem:[%s4021_s4] sm:$0xff]  }
0x14df   :  { %v2325_v39 = vmul.f32 %v2305_v20, %v3940_v52  ;;  %2653 = vmatpush3.bf16.msra.mxu1 %v2674_v62 }
0x14e0   :  { %2342 = vrot.lane.b32.xlu1 %v2324_v40, %s2939_s14  ;;  %2654 = vmatprep.subr.bf16.mxu1 %v2937_v24 }
0x14e1   :  { %2344 = vrot.lane.b32.xlu0 %v2325_v39, %s2939_s14  ;;  %v2307_v34 = vpop.permute.xlu1 %2306 }
0x14e2   :  { %v2309_v18 = vpop.permute.xlu0 %2308  ;;  %v2326_v50 = vmul.f32 %v2307_v34, %v3945_v44 }
0x14e3   :  { %v2327_v46 = vmul.f32 %v2309_v18, %v3948_v22  ;;  %2655 = vmatpush3.bf16.msra.mxu1 %v2675_v38 }
0x14e4   :  { %2346 = vrot.lane.b32.xlu1 %v2326_v50, %s2939_s14 }
0x14e5   :  { %2348 = vrot.lane.b32.xlu0 %v2327_v46, %s2939_s14  ;;  %v2311_v61 = vpop.permute.xlu1 %2310 }
0x14e6   :  { %v2313_v48 = vpop.permute.xlu0 %2312  ;;  %v2328_v35 = vmul.f32 %v2311_v61, %v3953_v23 }
0x14e7   :  { %v2329_v36 = vmul.f32 %v2313_v48, %v3956_v15 }
0x14e8   :  { %2350 = vrot.lane.b32.xlu1 %v2328_v35, %s2939_s14 }
0x14e9   :  { %2352 = vrot.lane.b32.xlu0 %v2329_v36, %s2939_s14 }
0x154e   :  { %v2339_v42 = vpop.permute.xlu1 %2338 }
0x154f   :  { %v2341_v58 = vpop.permute.xlu0 %2340  ;;  %v2362_v14 = vadd.f32 %v2339_v42, %v2282_v57 }
0x1550   :  { %v2363_v12 = vadd.f32 %v2341_v58, %v2283_v10 }
0x1551   :  { %2916 = vtanh.f32 %v2362_v14 }
0x1552   :  { %2918 = vtanh.f32 %v2363_v12  ;;  %v2343_v16 = vpop.permute.xlu1 %2342 }
0x1553   :  { %v2345_v51 = vpop.permute.xlu0 %2344  ;;  %v2364_v26 = vadd.f32 %v2343_v16, %v2284_v1 }
0x1554   :  { %v2365_v30 = vadd.f32 %v2345_v51, %v2285_v56 }
0x1555   :  { %2920 = vtanh.f32 %v2364_v26 }
0x1556   :  { %2922 = vtanh.f32 %v2365_v30  ;;  %v2347_v21 = vpop.permute.xlu1 %2346 }
0x1557   :  { %v2349_v45 = vpop.permute.xlu0 %2348  ;;  %v2366_v29 = vadd.f32 %v2347_v21, %v2286_v27 }
0x1558   :  { %v2367_v11 = vadd.f32 %v2349_v45, %v2287_v2 }
0x1559   :  { %2924 = vtanh.f32 %v2366_v29 }
0x155a   :  { %2926 = vtanh.f32 %v2367_v11  ;;  %v2351_v13 = vpop.permute.xlu1 %2350 }
0x155b   :  { %v2917_v54 = vpop.eup %2916  ;;  %v2353_v8 = vpop.permute.xlu0 %2352  ;;  %v2368_v9 = vadd.f32 %v2351_v13, %v2288_v5  ;;  %v2550_v5 = vld [vmem:[%s4022_s5] ss:$0 sm:$0xff] }
0x155c   :  { %v2919_v53 = vpop.eup %2918  ;;  %v2369_v55 = vadd.f32 %v2353_v8, %v2289_v47  ;;  %2386 = vrot.lane.b32.xlu1 %v2917_v54, %s2935_s0 }
0x155d   :  { %2928 = vtanh.f32 %v2368_v9  ;;  %2388 = vrot.lane.b32.xlu0 %v2919_v53, %s2935_s0 }
0x155e   :  { %2930 = vtanh.f32 %v2369_v55 }
0x155f   :  { %v2921_v28 = vpop.eup %2920 }
0x1560   :  { %v2923_v6 = vpop.eup %2922  ;;  %2390 = vrot.lane.b32.xlu1 %v2921_v28, %s2935_s0 }
0x1561   :  { %2392 = vrot.lane.b32.xlu0 %v2923_v6, %s2935_s0 }
0x1563   :  { %v2925_v49 = vpop.eup %2924 }
0x1564   :  { %v2927_v41 = vpop.eup %2926  ;;  %2394 = vrot.lane.b32.xlu1 %v2925_v49, %s2935_s0 }
0x1565   :  { %2396 = vrot.lane.b32.xlu0 %v2927_v41, %s2935_s0 }
0x1567   :  { %v2929_v43 = vpop.eup %2928 }
0x1568   :  { %v2931_v3 = vpop.eup %2930  ;;  %2398 = vrot.lane.b32.xlu1 %v2929_v43, %s2935_s0 }
0x1569   :  { %2400 = vrot.lane.b32.xlu0 %v2931_v3, %s2935_s0 }
0x15ce   :  { %v2387_v20 = vpop.permute.xlu1 %2386 }
0x15cf   :  { %v2389_v40 = vpop.permute.xlu0 %2388  ;;  %v2410_v39 = vmul.f32 %v2387_v20, %v3930_v63 }
0x15d0   :  { %v2411_v7 = vmul.f32 %v2389_v40, %v3932_v59 }
0x15d1   :  { %v2418_v34 = vpack.c.bf16 %v2410_v39, %v2410_v39 }
0x15d2   :  { %v2419_v4 = vpack.c.bf16 %v2411_v7, %v2411_v7  ;;  %v2391_v18 = vpop.permute.xlu1 %2390 }
0x15d3   :  { %v2445_v50 = vunpack.c.l.b16 %v2418_v34  ;;  %v2393_v46 = vpop.permute.xlu0 %2392  ;;  %v2412_v61 = vmul.f32 %v2391_v18, %v3937_v31 }
0x15d4   :  { %v2446_v48 = vunpack.c.l.b16 %v2419_v4  ;;  %v2413_v35 = vmul.f32 %v2393_v46, %v3940_v52 }
0x15d5   :  { %v2420_v36 = vpack.c.bf16 %v2412_v61, %v2412_v61  ;;  %v2453_v24 = vrot.slane %v2445_v50, 7 }
0x15d6   :  { %v2454_v17 = vrot.slane %v2446_v48, 6  ;;  %v2421_v60 = vpack.c.bf16 %v2413_v35, %v2413_v35  ;;  %v2395_v57 = vpop.permute.xlu1 %2394 }
0x15d7   :  { %v2447_v10 = vunpack.c.l.b16 %v2420_v36  ;;  %v2397_v42 = vpop.permute.xlu0 %2396  ;;  %v2414_v63 = vmul.f32 %v2395_v57, %v3945_v44 }
0x15d8   :  { %v2448_v59 = vunpack.c.l.b16 %v2421_v60  ;;  %v2415_v0 = vmul.f32 %v2397_v42, %v3948_v22  ;;  %v2455_v19 = vsel %vm308_vm5, %v2454_v17, %v2453_v24 }
0x15d9   :  { %v2456_v58 = vrot.slane %v2447_v10, 5  ;;  %v2422_v14 = vpack.c.bf16 %v2414_v63, %v2414_v63 }
0x15da   :  { %v2458_v31 = vrot.slane %v2448_v59, 4  ;;  %v2423_v12 = vpack.c.bf16 %v2415_v0, %v2415_v0  ;;  %v2399_v1 = vpop.permute.xlu1 %2398 }
0x15db   :  { %v2457_v52 = vsel %vm311_vm6, %v2456_v58, %v2455_v19  ;;  %v2449_v56 = vunpack.c.l.b16 %v2422_v14  ;;  %v2401_v16 = vpop.permute.xlu0 %2400  ;;  %v2416_v32 = vmul.f32 %v2399_v1, %v3953_v23 }
0x15dc   :  { %v2450_v51 = vunpack.c.l.b16 %v2423_v12  ;;  %v2417_v26 = vmul.f32 %v2401_v16, %v3956_v15  ;;  %v2459_v22 = vsel %vm314_vm7, %v2458_v31, %v2457_v52 }
0x15dd   :  { %v2460_v44 = vrot.slane %v2449_v56, 3  ;;  %v2424_v33 = vpack.c.bf16 %v2416_v32, %v2416_v32 }
0x15de   :  { %v2462_v30 = vrot.slane %v2450_v51, 2  ;;  %v2425_v27 = vpack.c.bf16 %v2417_v26, %v2417_v26 }
0x15df   :  { %v2461_v2 = vsel %vm317_vm8, %v2460_v44, %v2459_v22  ;;  %v2451_v21 = vunpack.c.l.b16 %v2424_v33 }
0x15e0   :  { %v2452_v45 = vunpack.c.l.b16 %v2425_v27  ;;  %v2463_v29 = vsel %vm320_vm9, %v2462_v30, %v2461_v2 }
0x15e1   :  { %v2464_v25 = vrot.slane %v2451_v21, 1 }
0x15e3   :  { %v2465_v37 = vsel %vm323_vm10, %v2464_v25, %v2463_v29 }
0x15e4   :  { %v2466_v23 = vsel %vm326_vm11, %v2452_v45, %v2465_v37 }
0x15e5   :  { %v2467_v11 = vpack.c.b16 %v2466_v23, %v2466_v23 }
0x15e7   :  { %2468 = vrot.lane.b32.xlu1 %v2467_v11, %s2939_s14 }
0x1659   :  { %v2469_v15 = vpop.permute.xlu1 %2468 }
0x165a   :  { %2657 = vmatmul.mubr.msk.bf16.vlgmr.msra.gmra.mrb[16].mxu1 %vm79_vm0, %v2469_v15 }
0x172d   :  { %v2519_v47 = vpop.f32.mrb[16].mxu1 }
0x172e   :  { %v2520_v13 = vadd.f32 %v2550_v5, %v2519_v47  ;;  %v2658_v54 = vpop.f32.mrb[17].mxu1 }
0x172f   :  { %v2522_v8 = vpop.f32.mrb[18].mxu1 }
0x1730   :  { %2525 = vst.msk [vmem:[%s4023_s6] sm:$0xff] %vm79_vm0, %v2520_v13  ;;  %v2659_v9 = vpop.f32.mrb[19].mxu1 }

</bundles_post_ra>
